<compile_context>
chip_gen: v6e
topology: v6e:2x2x1
jax: 0.10.0
libtpu: 0.0.40
codegen_flags: <defaults>
</compile_context>

<pallas_src>
import jax
import jax.numpy as jnp
from jax.experimental import pallas as pl
from jax.experimental.pallas import tpu as pltpu


def _round_up(x, m):
    return ((x + m - 1) // m) * m


# Keep the steady-state tile footprint well under v7x's 64 MiB/TC.
_VMEM_TILE_BUDGET = 40 * 1024 * 1024
_VMEM_LIMIT_CAP = 56 * 1024 * 1024


def _vmem_bytes(tm, tk, f_in, f_out_pad):
    """Conservative steady-state VMEM footprint (double-buffered pipeline)."""
    b = 0
    b += 2 * tm * tk * 2                  # adj tiles (bf16, x2 buffers)
    b += 2 * tk * f_in * 2                # neighbor features (bf16, x2)
    b += 2 * tm * f_in * 4                # self features (f32, x2)
    b += 2 * 2 * f_in * f_out_pad * 4     # W_self + W_neigh (f32, x2 each)
    b += 2 * tm * f_out_pad * 4           # output tiles (f32, x2)
    b += tm * f_in * 4                    # acc scratch (f32)
    b += tm * 128 * 4                     # deg scratch (lane-padded)
    return b


def _graphsage_kernel(adj_ref, nfeat_ref, sfeat_ref, w_self_ref, w_neigh_ref,
                      out_ref, acc_ref, deg_ref):
    k = pl.program_id(1)

    @pl.when(k == 0)
    def _init():
        acc_ref[...] = jnp.zeros_like(acc_ref)
        deg_ref[...] = jnp.zeros_like(deg_ref)

    # Aggregation: bf16 x bf16 on the native MXU path, f32 accumulation.
    adj = adj_ref[...]
    acc_ref[...] += jnp.dot(adj, nfeat_ref[...],
                            preferred_element_type=jnp.float32)
    # Degree accumulation: XLU cross-lane reduce (free slack when HBM-bound).
    deg_ref[...] += jnp.sum(adj.astype(jnp.float32), axis=-1, keepdims=True)

    @pl.when(k == pl.num_programs(1) - 1)
    def _finalize():
        # Row-wise normalization commutes with the projection; apply once here.
        inv_deg = pl.reciprocal(deg_ref[...] + 1.0, approx=False)   # (tm, 1)
        neigh = acc_ref[...] * inv_deg                              # (tm, f_in)
        out = jnp.dot(sfeat_ref[...], w_self_ref[...],
                      preferred_element_type=jnp.float32)
        out += jnp.dot(neigh, w_neigh_ref[...],
                       preferred_element_type=jnp.float32)
        out_ref[...] = out.astype(out_ref.dtype)


def graphsage_conv(features, adj, weight, *, tm=None, tk=None):
    """features: [N, F_in] f32, adj: [N, N] dense 0/1, weight: [F_out, 2*F_in] (torch layout)."""
    n, f_in = features.shape
    f_out = weight.shape[0]
    f_out_pad = _round_up(f_out, 128)

    # --- tile selection -----------------------------------------------------
    if tm is None:
        tm = min(512, _round_up(n, 8))
        # Keep >= 2 row blocks so the "parallel" row axis can be split across
        # v7x's two TensorCores even for modest graphs.
        if n >= 16 and _round_up(n, tm) // tm < 2:
            tm = _round_up((n + 1) // 2, 8)
    if tk is None:
        tk = min(2048, _round_up(n, 128))
        # Shrink tk (keeping a 128 multiple) if the footprint would overflow
        # the per-TensorCore budget (relevant for very large f_in / f_out).
        while _vmem_bytes(tm, tk, f_in, f_out_pad) > _VMEM_TILE_BUDGET and tk > 128:
            tk = max(128, ((tk // 2) // 128) * 128)

    # Independent row / column padding (no lcm blow-up); adj may be non-square
    # after padding.  Zero rows/cols are exact no-ops (deg=0 -> inv=1, out=0).
    n_rows = _round_up(n, tm)
    n_cols = _round_up(n, tk)

    # bf16 adjacency + neighbor features on the wire (bf16 is exact for a 0/1
    # mask; features are rounded to bf16 only for the aggregation stream).
    adj_p = jnp.pad(adj.astype(jnp.bfloat16),
                    ((0, n_rows - n), (0, n_cols - n)))
    nfeat_p = jnp.pad(features.astype(jnp.bfloat16),
                      ((0, n_cols - n), (0, 0)))
    sfeat_p = jnp.pad(features.astype(jnp.float32),
                      ((0, n_rows - n), (0, 0)))

    # Split torch-layout weight into self / neighbor halves, transpose, and
    # zero-pad F_out to a lane-dense multiple of 128 (sliced back below).
    w = weight.astype(jnp.float32)
    w_self = jnp.pad(w[:, :f_in].T, ((0, 0), (0, f_out_pad - f_out)))
    w_neigh = jnp.pad(w[:, f_in:].T, ((0, 0), (0, f_out_pad - f_out)))

    grid = (n_rows // tm, n_cols // tk)

    est = _vmem_bytes(tm, tk, f_in, f_out_pad)
    vmem_limit = int(min(_VMEM_LIMIT_CAP, max(2 * est, 32 * 1024 * 1024)))

    out = pl.pallas_call(
        _graphsage_kernel,
        out_shape=jax.ShapeDtypeStruct((n_rows, f_out_pad), jnp.float32),
        grid_spec=pltpu.PrefetchScalarGridSpec(
            num_scalar_prefetch=0,
            grid=grid,
            in_specs=[
                pl.BlockSpec((tm, tk), lambda i, k: (i, k)),           # adj tile (bf16)
                pl.BlockSpec((tk, f_in), lambda i, k: (k, 0)),         # neighbor feats (bf16)
                pl.BlockSpec((tm, f_in), lambda i, k: (i, 0)),         # self feats (f32)
                pl.BlockSpec((f_in, f_out_pad), lambda i, k: (0, 0)),  # W_self (resident)
                pl.BlockSpec((f_in, f_out_pad), lambda i, k: (0, 0)),  # W_neigh (resident)
            ],
            out_specs=pl.BlockSpec((tm, f_out_pad), lambda i, k: (i, 0)),
            scratch_shapes=[
                pltpu.VMEM((tm, f_in), jnp.float32),   # adj @ feat accumulator
                pltpu.VMEM((tm, 1), jnp.float32),      # degree accumulator
            ],
        ),
        compiler_params=pltpu.CompilerParams(
            dimension_semantics=("parallel", "arbitrary"),
            vmem_limit_bytes=vmem_limit,
        ),
    )(adj_p, nfeat_p, sfeat_p, w_self, w_neigh)

    return out[:n, :f_out]


def graphsage_ref(features, adj, weight):
    """Full-f32 reference (matches the PyTorch module)."""
    hi = jax.lax.Precision.HIGHEST
    neigh = jnp.dot(adj, features, precision=hi) / (
        jnp.sum(adj, axis=1, keepdims=True) + 1.0)
    data = jnp.concatenate([features, neigh], axis=-1)
    return jnp.dot(data, weight.T, precision=hi)


def graphsage_ref_bf16_agg(features, adj, weight):
    """Reference emulating the kernel's bf16 aggregation operands (tight check)."""
    hi = jax.lax.Precision.HIGHEST
    f_in = features.shape[1]
    f_bf = features.astype(jnp.bfloat16).astype(jnp.float32)
    a_bf = adj.astype(jnp.bfloat16).astype(jnp.float32)
    neigh = jnp.dot(a_bf, f_bf, precision=hi) / (
        jnp.sum(adj, axis=1, keepdims=True) + 1.0)
    return (jnp.dot(features, weight[:, :f_in].T, precision=hi)
            + jnp.dot(neigh, weight[:, f_in:].T, precision=hi))


if __name__ == "__main__":
    key = jax.random.PRNGKey(0)
    k_feat, k_adj, k_w = jax.random.split(key, 3)

    # Deliberately non-aligned N and F_out to exercise the padding/slicing path.
    N, F_IN, F_OUT = 300, 32, 48

    features = jax.random.normal(k_feat, (N, F_IN), dtype=jnp.float32)
    adj = (jax.random.uniform(k_adj, (N, N)) < 0.1).astype(jnp.float32)
    # nn.init.normal_ on proj.weight of shape [out_features, 2*in_features].
    weight = jax.random.normal(k_w, (F_OUT, 2 * F_IN), dtype=jnp.float32)

    ref_f32 = graphsage_ref(features, adj, weight)
    ref_bf16 = graphsage_ref_bf16_agg(features, adj, weight)

    # Default (large) tiles, plus explicit small tiles so the multi-step
    # k-reduction / accumulator / multi-row-block path is exercised at small N.
    out_default = jax.block_until_ready(graphsage_conv(features, adj, weight))
    out_small = jax.block_until_ready(
        graphsage_conv(features, adj, weight, tm=128, tk=128))

    assert out_default.shape == (N, F_OUT)
    for name, out in (("default tiles", out_default), ("small tiles", out_small)):
        # Tight check vs a reference using the same bf16 aggregation operands.
        assert jnp.allclose(out, ref_bf16, atol=2e-3, rtol=2e-3), \
            f"mismatch vs bf16-agg reference ({name})"
        # Looser check vs the full-f32 reference (bf16 feature rounding only).
        assert jnp.allclose(out, ref_f32, atol=3e-2, rtol=3e-2), \
            f"mismatch vs f32 reference ({name})"

    print("KERNEL_OK")
</pallas_src>

<mosaic_0001>
module attributes {stable_mosaic.version = 11 : i64} {
  func.func @_graphsage_kernel(%arg0: i32, %arg1: i32, %arg2: memref<152x384xbf16, #tpu.memory_space<vmem>>, %arg3: memref<384x32xbf16, #tpu.memory_space<vmem>>, %arg4: memref<152x32xf32, #tpu.memory_space<vmem>>, %arg5: memref<32x128xf32, #tpu.memory_space<vmem>>, %arg6: memref<32x128xf32, #tpu.memory_space<vmem>>, %arg7: memref<152x128xf32, #tpu.memory_space<vmem>>, %arg8: memref<152x32xf32, #tpu.memory_space<vmem>>, %arg9: memref<152x1xf32, #tpu.memory_space<vmem>>) attributes {dimension_semantics = [#tpu.dimension_semantics<parallel>, #tpu.dimension_semantics<arbitrary>], iteration_bounds = array<i64: 2, 1>, scalar_prefetch = 0 : i64, scratch_operands = 2 : i64, tpu.core_type = #tpu.core_type<tc>, window_params = [{transform_indices = @transform_0, window_bounds = array<i64: 152, 384>}, {transform_indices = @transform_1, window_bounds = array<i64: 384, 32>}, {transform_indices = @transform_2, window_bounds = array<i64: 152, 32>}, {pipeline_mode = #tpu.pipeline_mode<synchronous>, transform_indices = @transform_3, window_bounds = array<i64: 32, 128>}, {pipeline_mode = #tpu.pipeline_mode<synchronous>, transform_indices = @transform_4, window_bounds = array<i64: 32, 128>}, {transform_indices = @transform_5, window_bounds = array<i64: 152, 128>}]} {
    %c0_i32 = arith.constant 0 : i32
    %0 = arith.cmpi eq, %arg1, %c0_i32 : i32
    %1 = arith.extui %0 : i1 to i32
    %c0_i32_0 = arith.constant 0 : i32
    %2 = arith.cmpi ne, %1, %c0_i32_0 : i32
    scf.if %2 {
      %cst_15 = arith.constant 0.000000e+00 : f32
      %18 = vector.broadcast %cst_15 : f32 to vector<152x32xf32>
      %c0_16 = arith.constant 0 : index
      %c0_17 = arith.constant 0 : index
      %19 = vector.load %arg8[%c0_16, %c0_17] : memref<152x32xf32, #tpu.memory_space<vmem>>, vector<152x32xf32>
      tpu.vector_store %arg8[%c0_16, %c0_17], %18 {strides = array<i32>} : memref<152x32xf32, #tpu.memory_space<vmem>>, vector<152x32xf32>,
      %cst_18 = arith.constant 0.000000e+00 : f32
      %20 = vector.broadcast %cst_18 : f32 to vector<152x1xf32>
      %c0_19 = arith.constant 0 : index
      %c0_20 = arith.constant 0 : index
      %21 = vector.load %arg9[%c0_19, %c0_20] : memref<152x1xf32, #tpu.memory_space<vmem>>, vector<152x1xf32>
      tpu.vector_store %arg9[%c0_19, %c0_20], %20 {strides = array<i32>} : memref<152x1xf32, #tpu.memory_space<vmem>>, vector<152x1xf32>,
    } else {
    }
    %c0 = arith.constant 0 : index
    %c0_1 = arith.constant 0 : index
    %3 = vector.load %arg2[%c0, %c0_1] : memref<152x384xbf16, #tpu.memory_space<vmem>>, vector<152x384xbf16>
    %c0_2 = arith.constant 0 : index
    %c0_3 = arith.constant 0 : index
    %4 = vector.load %arg8[%c0_2, %c0_3] : memref<152x32xf32, #tpu.memory_space<vmem>>, vector<152x32xf32>
    %c0_4 = arith.constant 0 : index
    %c0_5 = arith.constant 0 : index
    %5 = vector.load %arg3[%c0_4, %c0_5] : memref<384x32xbf16, #tpu.memory_space<vmem>>, vector<384x32xbf16>
    %cst = arith.constant dense<0.000000e+00> : vector<152x32xf32>
    %6 = tpu.matmul %3, %5, %cst {dimension_numbers = #tpu.dot_dimension_numbers<[1], [0], [0], [1], [0, 0, 1, 1], [], []>} : vector<152x384xbf16>, vector<384x32xbf16>, vector<152x32xf32> -> vector<152x32xf32>
    %7 = arith.addf %4, %6 : vector<152x32xf32>
    %c0_6 = arith.constant 0 : index
    %c0_7 = arith.constant 0 : index
    %8 = vector.load %arg8[%c0_6, %c0_7] : memref<152x32xf32, #tpu.memory_space<vmem>>, vector<152x32xf32>
    tpu.vector_store %arg8[%c0_6, %c0_7], %7 {strides = array<i32>} : memref<152x32xf32, #tpu.memory_space<vmem>>, vector<152x32xf32>,
    %c0_8 = arith.constant 0 : index
    %c0_9 = arith.constant 0 : index
    %9 = vector.load %arg9[%c0_8, %c0_9] : memref<152x1xf32, #tpu.memory_space<vmem>>, vector<152x1xf32>
    %10 = arith.extf %3 : vector<152x384xbf16> to vector<152x384xf32>
    %cst_10 = arith.constant dense<0.000000e+00> : vector<152xf32>
    %11 = vector.multi_reduction <add>, %10, %cst_10 [1] : vector<152x384xf32> to vector<152xf32>
    %12 = vector.shape_cast %11 : vector<152xf32> to vector<152x1xf32>
    %13 = arith.addf %9, %12 : vector<152x1xf32>
    %c0_11 = arith.constant 0 : index
    %c0_12 = arith.constant 0 : index
    %14 = vector.load %arg9[%c0_11, %c0_12] : memref<152x1xf32, #tpu.memory_space<vmem>>, vector<152x1xf32>
    tpu.vector_store %arg9[%c0_11, %c0_12], %13 {strides = array<i32>} : memref<152x1xf32, #tpu.memory_space<vmem>>, vector<152x1xf32>,
    %c0_i32_13 = arith.constant 0 : i32
    %15 = arith.cmpi eq, %arg1, %c0_i32_13 : i32
    %16 = arith.extui %15 : i1 to i32
    %c0_i32_14 = arith.constant 0 : i32
    %17 = arith.cmpi ne, %16, %c0_i32_14 : i32
    scf.if %17 {
      %c0_15 = arith.constant 0 : index
      %c0_16 = arith.constant 0 : index
      %18 = vector.load %arg9[%c0_15, %c0_16] : memref<152x1xf32, #tpu.memory_space<vmem>>, vector<152x1xf32>
      %cst_17 = arith.constant 1.000000e+00 : f32
      %19 = vector.broadcast %cst_17 : f32 to vector<152x1xf32>
      %20 = arith.addf %18, %19 : vector<152x1xf32>
      %21 = tpu.reciprocal %20 : vector<152x1xf32> -> vector<152x1xf32>
      %c0_18 = arith.constant 0 : index
      %c0_19 = arith.constant 0 : index
      %22 = vector.load %arg8[%c0_18, %c0_19] : memref<152x32xf32, #tpu.memory_space<vmem>>, vector<152x32xf32>
      %23 = vector.broadcast %21 : vector<152x1xf32> to vector<152x32xf32>
      %24 = arith.mulf %22, %23 : vector<152x32xf32>
      %c0_20 = arith.constant 0 : index
      %c0_21 = arith.constant 0 : index
      %25 = vector.load %arg4[%c0_20, %c0_21] : memref<152x32xf32, #tpu.memory_space<vmem>>, vector<152x32xf32>
      %c0_22 = arith.constant 0 : index
      %c0_23 = arith.constant 0 : index
      %26 = vector.load %arg5[%c0_22, %c0_23] : memref<32x128xf32, #tpu.memory_space<vmem>>, vector<32x128xf32>
      %cst_24 = arith.constant dense<0.000000e+00> : vector<152x128xf32>
      %27 = tpu.matmul %25, %26, %cst_24 {dimension_numbers = #tpu.dot_dimension_numbers<[1], [0], [0], [1], [0, 0, 1, 1], [], []>} : vector<152x32xf32>, vector<32x128xf32>, vector<152x128xf32> -> vector<152x128xf32>
      %c0_25 = arith.constant 0 : index
      %c0_26 = arith.constant 0 : index
      %28 = vector.load %arg6[%c0_25, %c0_26] : memref<32x128xf32, #tpu.memory_space<vmem>>, vector<32x128xf32>
      %cst_27 = arith.constant dense<0.000000e+00> : vector<152x128xf32>
      %29 = tpu.matmul %24, %28, %cst_27 {dimension_numbers = #tpu.dot_dimension_numbers<[1], [0], [0], [1], [0, 0, 1, 1], [], []>} : vector<152x32xf32>, vector<32x128xf32>, vector<152x128xf32> -> vector<152x128xf32>
      %30 = arith.addf %27, %29 : vector<152x128xf32>
      %c0_28 = arith.constant 0 : index
      %c0_29 = arith.constant 0 : index
      %31 = vector.load %arg7[%c0_28, %c0_29] : memref<152x128xf32, #tpu.memory_space<vmem>>, vector<152x128xf32>
      tpu.vector_store %arg7[%c0_28, %c0_29], %30 {strides = array<i32>} : memref<152x128xf32, #tpu.memory_space<vmem>>, vector<152x128xf32>,
    } else {
    }
    return
  }
  func.func @transform_0(%arg0: i32, %arg1: i32) -> (i32, i32) {
    %c0_i32 = arith.constant 0 : i32
    return %arg0, %arg1 : i32, i32
  }
  func.func @transform_1(%arg0: i32, %arg1: i32) -> (i32, i32) {
    %c0_i32 = arith.constant 0 : i32
    %c0_i32_0 = arith.constant 0 : i32
    return %arg1, %c0_i32 : i32, i32
  }
  func.func @transform_2(%arg0: i32, %arg1: i32) -> (i32, i32) {
    %c0_i32 = arith.constant 0 : i32
    %c0_i32_0 = arith.constant 0 : i32
    return %arg0, %c0_i32 : i32, i32
  }
  func.func @transform_3(%arg0: i32, %arg1: i32) -> (i32, i32) {
    %c0_i32 = arith.constant 0 : i32
    %c0_i32_0 = arith.constant 0 : i32
    %c0_i32_1 = arith.constant 0 : i32
    return %c0_i32, %c0_i32_0 : i32, i32
  }
  func.func @transform_4(%arg0: i32, %arg1: i32) -> (i32, i32) {
    %c0_i32 = arith.constant 0 : i32
    %c0_i32_0 = arith.constant 0 : i32
    %c0_i32_1 = arith.constant 0 : i32
    return %c0_i32, %c0_i32_0 : i32, i32
  }
  func.func @transform_5(%arg0: i32, %arg1: i32) -> (i32, i32) {
    %c0_i32 = arith.constant 0 : i32
    %c0_i32_0 = arith.constant 0 : i32
    return %arg0, %c0_i32 : i32, i32
  }
}

</mosaic_0001>

<bundles_post_ra>
// kernel: tpu_custom_call.1
= control target key start
LH: loop header
LB: loop body
LE: loop exit
PB: predicated region body
PF: predicated region fallthrough
CT: control target
= control target key end

     0   :  { %10 = vsyncpa [#allocation5], 0  ;;  %s3434_s0 = inlined_call_operand.vmem [shape: bf16[304,384], index: 0, kind: input, shape index: {}]   ;;  %s3435_s1 = inlined_call_operand.vmem [shape: bf16[384,32], index: 1, kind: input, shape index: {}]   ;;  %s3436_s2 = inlined_call_operand.vmem [shape: f32[304,32], index: 2, kind: input, shape index: {}]   ;;  %s3437_s3 = inlined_call_operand.vmem [shape: f32[32,128], index: 3, kind: input, shape index: {}]   ;;  %s3438_s4 = inlined_call_operand.vmem [shape: f32[32,128], index: 4, kind: input, shape index: {}]   ;;  %s3439_s5 = inlined_call_operand.hbm [shape: f32[304,128], index: 5, kind: output, shape index: {}]  }
   0x1   :  { %12 = vsyncpa [#allocation5 + $0x1], 0  ;;  %s2682_s18 = smov 0   ;;  %s2684_s19 = smov 0  }
   0x2   :  { %s2686_s20 = smov 0   ;;  %s2688_s21 = smov 0  }
   0x3   :  { %s2690_s22 = smov 0   ;;  %s2692_s23 = smov 0  }
   0x4 LB: > { %s1994_s24 = sadd.s32 4294967295, %s2644_s23   ;;  %s1995_s25 = sadd.s32 4294967294, %s2644_s23   ;;  %s2644_s23 = sphi %s2692_s23, %s18_s23   ;;  %s2640_s22 = sphi %s2690_s22, %s3446_s22   ;;  %s2636_s21 = sphi %s2688_s21, %s3445_s21   ;;  %s2632_s20 = sphi %s2686_s20, %s3444_s20   ;;  %s2628_s19 = sphi %s2684_s19, %s3443_s19   ;;  %s2624_s18 = sphi %s2682_s18, %s3442_s18  }
   0x5   : > { %s30_s26 = sadd.s32 1, %s2640_s22  ;;  %s159_s27 = sadd.s32 1, %s2632_s20 }
   0x6   : > { %p32_p0 = scmp.ge.s32.totalorder %s30_s26, 2  ;;  %p169_p1 = scmp.ne.s32.totalorder %s2632_s20, %s2628_s19 }
   0x7   : > { %p170_p2 = scmp.eq.s32.totalorder %s1994_s24, 1  ;;  %p175_p3 = scmp.ne.s32.totalorder %s2628_s19, %s2624_s18 }
   0x8   : > { %s3448_s26 = smov (%p32_p0, %s30_s26), 0  ;;  %p176_p5 = scmp.eq.s32.totalorder %s1995_s25, 1 }
   0x9   : > { %p2722_p4 = por %p170_p2, %p169_p1  ;;  %s156_s29 = ssub.s32 %s2640_s22, %s3448_s26 }
   0xa   : > { %p1999_p6 = scmp.ge.s32.totalorder %s2644_s23, 1  ;;  %p157_p7 = scmp.eq.s32.totalorder %s156_s29, 0 }
   0xb   : > { %p2729_p8 = por %p176_p5, %p175_p3  ;;  %p233_p9 = scmp.lt.s32.totalorder %s2644_s23, 3 }
   0xc   : > { %s2735_s6 = scalar_select %p157_p7, %s2632_s20, %s159_s27  }
   0xd   : > { %p234_p10 = pnand %p1999_p6, %p233_p9 }
   0xe   : > { %s276_s7 = smul.u32 (!%p234_p10), 19, %s2636_s21 }
   0xf   : > { %237 = sbr.rel (%p234_p10) target bundleno = 622 (0x26e), region = 40 }
  0x10   : > { %p278_p11 = scmp.lt.s32.totalorder (!%p234_p10), %s276_s7, 37  ;;  %s2097_s14 = smul.u32 (!%p234_p10), 2432, %s2636_s21 }
  0x12   : > { %s3382_s17 = scalar_lea.hbm (!%p234_p10), %s3439_s5, %s2097_s14 }
  0x14   : > { %v2476_v0 = vld [vmem:[%s3435_s1 + $0x78] sm:$0xff]   ;;  %v2478_v2 = vld [vmem:[%s3435_s1 + $0x70] sm:$0xff]   ;;  %vm326_vm0 = vcmask 7168   ;;  %s3450_s7 = smov (!%p278_p11, %s276_s7), 37  ;;  %v2480_v4 = vld [vmem:[%s3435_s1 + $0x68] sm:$0xff]   ;;  %v2646_v5 = vmov 0.0  }
  0x15   : > { %v2477_v1 = vld [vmem:[%s3435_s1 + $0x38] sm:$0xff]   ;;  %2098 = vmatprep.subr.bf16.mxu0 %v2476_v0  ;;  %v2479_v3 = vld [vmem:[%s3435_s1 + $0x30] sm:$0xff]   ;;  %327 = vst.msk [vmem:[#allocation3] sm:$0xff] %vm326_vm0, %v2646_v5  ;;  %328 = vst.msk [vmem:[#allocation3 + $0x8] sm:$0xff] %vm326_vm0, %v2646_v5  ;;  %s2413_s24 = smul.u32 12, %s3450_s7  ;;  %vm306_vm1 = vcmask 261120  }
  0x16   : > { %2099 = vmatpush3.bf16.msra.mxu0 %v2477_v1  ;;  %329 = vst.msk [vmem:[#allocation3 + $0x10] sm:$0xff] %vm326_vm0, %v2646_v5  ;;  %330 = vst.msk [vmem:[#allocation3 + $0x18] sm:$0xff] %vm326_vm0, %v2646_v5  ;;  %v2481_v6 = vld [vmem:[%s3435_s1 + $0x28] sm:$0xff]   ;;  %v2482_v7 = vld [vmem:[%s3435_s1 + $0x60] sm:$0xff]   ;;  %s2001_s25 = sshll.u32 %s3450_s7, 3  ;;  %vm2648_vm2 = vmmov 0  }
  0x17   : > { %2100 = vmatprep.subr.bf16.mxu0 %v2478_v2  ;;  %331 = vst.msk [vmem:[#allocation3 + $0x20] sm:$0xff] %vm326_vm0, %v2646_v5  ;;  %332 = vst.msk [vmem:[#allocation3 + $0x28] sm:$0xff] %vm326_vm0, %v2646_v5  ;;  %s2800_s9 = scalar_lea.vmem %s3434_s0, %s2413_s24  ;;  %v2483_v11 = vld [vmem:[%s3435_s1 + $0x20] sm:$0xff]   ;;  %v2484_v31 = vld [vmem:[%s3435_s1 + $0x58] sm:$0xff]   ;;  %s3184_s11 = scalar_lea.vmem %s3436_s2, %s2001_s25 }
  0x18   : > { %333 = vst.msk [vmem:[#allocation3 + $0x30] sm:$0xff] %vm326_vm0, %v2646_v5  ;;  %334 = vst.msk [vmem:[#allocation3 + $0x38] sm:$0xff] %vm326_vm0, %v2646_v5  ;;  %v2806_v8 = vld [vmem:[%s2800_s9] sm:$0xff]  ;;  %v2809_v9 = vld [vmem:[%s2800_s9 + $0x8] sm:$0xf]  ;;  %s273_s7 = sand.u32 1, %s2628_s19  }
  0x19   : > { %335 = vst.msk [vmem:[#allocation3 + $0x40] sm:$0xff] %vm326_vm0, %v2646_v5  ;;  %336 = vst.msk [vmem:[#allocation3 + $0x48] sm:$0xff] %vm326_vm0, %v2646_v5  ;;  %v2812_v10 = vld [vmem:[%s2800_s9 + $0x18] sm:$0xff]  ;;  %v1032_v12 = vunpack.c.l.bf16 %v2806_v8  ;;  %v1033_v13 = vunpack.c.h.bf16 %v2806_v8  ;;  %v1034_v14 = vunpack.c.l.bf16 %v2809_v9  ;;  %v2821_v15 = vld [vmem:[%s2800_s9 + $0x20] sm:$0xf]  ;;  %s2412_s12 = smul.u32 152, %s273_s7 }
  0x1a   : > { %337 = vst.msk [vmem:[#allocation3 + $0x50] sm:$0xff] %vm326_vm0, %v2646_v5  ;;  %338 = vst.msk [vmem:[#allocation3 + $0x58] sm:$0xff] %vm326_vm0, %v2646_v5  ;;  %2101 = vmatpush3.bf16.msra.mxu0 %v2479_v3  ;;  %v1038_v16 = vunpack.c.l.bf16 %v2812_v10  ;;  %v2825_v17 = vld [vmem:[%s2800_s9 + $0xc] sm:$0xff]  ;;  %v2828_v18 = vld [vmem:[%s2800_s9 + $0x14] sm:$0xf]  ;;  %v1039_v19 = vunpack.c.h.bf16 %v2812_v10  ;;  %v1040_v20 = vunpack.c.l.bf16 %v2821_v15  ;;  %s3389_s21 = scalar_lea.sflag [#allocation5], %s273_s7 }
  0x1b   : > { %339 = vst.msk [vmem:[#allocation3 + $0x60] sm:$0xff] %vm326_vm0, %v2646_v5  ;;  %340 = vst.msk [vmem:[#allocation3 + $0x68] sm:$0xff] %vm326_vm0, %v2646_v5  ;;  %2102 = vmatprep.subr.bf16.mxu0 %v2480_v4  ;;  %v1035_v21 = vunpack.c.l.bf16 %v2825_v17  ;;  %v1036_v22 = vunpack.c.h.bf16 %v2825_v17  ;;  %v2835_v23 = vld [vmem:[%s2800_s9 + $0x24] sm:$0xff]  ;;  %v2838_v24 = vld [vmem:[%s2800_s9 + $0x2c] sm:$0xf]  ;;  %v1089_v26 = vadd.f32 %v1033_v13, %v1032_v12  ;;  %v1037_v27 = vunpack.c.l.bf16 %v2828_v18  ;;  %s3357_s13 = scalar_lea.vmem [#allocation4], %s2412_s12 }
  0x1c   : > { %341 = vst.msk [vmem:[#allocation3 + $0x70] sm:$0xff] %vm326_vm0, %v2646_v5  ;;  %342 = vst.msk [vmem:[#allocation3 + $0x78] sm:$0xff] %vm326_vm0, %v2646_v5  ;;  %v2841_v25 = vld [vmem:[%s2800_s9 + $0x30] sm:$0xff]  ;;  %v1041_v28 = vunpack.c.l.bf16 %v2835_v23  ;;  %v1042_v29 = vunpack.c.h.bf16 %v2835_v23  ;;  %v2847_v30 = vld [vmem:[%s2800_s9 + $0x48] sm:$0xff]  ;;  %v1097_v32 = vadd.f32 %v1039_v19, %v1038_v16  ;;  %v1043_v34 = vunpack.c.l.bf16 %v2838_v24  ;;  %s1891_s15 = sshll.u32 %s3357_s13, 4  ;;  %s2649_s25 = smov [#allocation4]   ;;  %s3384_s15 = int_to_ptr.vmem [resolvable:$true] %s1891_s15 }
  0x1d   : > { %343 = vst.msk [vmem:[#allocation3 + $0x80] sm:$0xff] %vm326_vm0, %v2646_v5  ;;  %344 = vst.msk [vmem:[#allocation3 + $0x88] sm:$0xff] %vm326_vm0, %v2646_v5  ;;  %v1093_v33 = vadd.f32 %v1036_v22, %v1035_v21  ;;  %v2854_v35 = vld [vmem:[%s2800_s9 + $0x38] sm:$0xf]  ;;  %v1044_v36 = vunpack.c.l.bf16 %v2841_v25  ;;  %v2858_v37 = vld [vmem:[%s2800_s9 + $0x3c] sm:$0xff]  ;;  %v1090_v38 = vadd.f32 %v1089_v26, %v1034_v14  ;;  %v1045_v40 = vunpack.c.h.bf16 %v2841_v25  ;;  %s2568_s24 = scalar_lea.vmem %s3384_s15, 2432 }
  0x1e   : > { %345 = vst.msk [vmem:[#allocation3 + $0x90] sm:$0xff] %vm326_vm0, %v2646_v5  ;;  %2103 = vmatpush3.bf16.msra.mxu0 %v2481_v6  ;;  %v1101_v39 = vadd.f32 %v1042_v29, %v1041_v28  ;;  %v2862_v41 = vld [vmem:[%s2800_s9 + $0x44] sm:$0xf]  ;;  %v1098_v42 = vadd.f32 %v1097_v32, %v1040_v20  ;;  %v2865_v43 = vld [vmem:[%s2800_s9 + $0x50] sm:$0xf]  ;;  %v1050_v44 = vunpack.c.l.bf16 %v2847_v30  ;;  %v1051_v45 = vunpack.c.h.bf16 %v2847_v30  ;;  %v2877_v54 = vld [vmem:[%s2800_s9 + $0x54] sm:$0xff]  ;;  %p2569_p12 = scmp.ne.s32.totalorder %s3384_s15, %s2568_s24 }
  0x1f   : > { %2104 = vmatprep.subr.bf16.mxu0 %v2482_v7  ;;  %1091 = vadd.xlane.f32.xlu0 %v1090_v38  ;;  %v1094_v46 = vadd.f32 %v1093_v33, %v1037_v27  ;;  %v1046_v47 = vunpack.c.l.bf16 %v2854_v35  ;;  %v1105_v48 = vadd.f32 %v1045_v40, %v1044_v36  ;;  %v1047_v49 = vunpack.c.l.bf16 %v2858_v37  ;;  %v2872_v50 = vld [vmem:[%s2800_s9 + $0x60] sm:$0xff]  ;;  %v2880_v55 = vld [vmem:[%s2800_s9 + $0x5c] sm:$0xf]  ;;  %v2486_v57 = vld [vmem:[%s3435_s1 + $0x50] sm:$0xff]   ;;  %309 = vst.msk [vmem:[#allocation2 + $0x10] sm:$0xff] %vm306_vm1, %v2646_v5  ;;  %s2572_s27 = sshll.u32 %s2649_s25, 4  ;;  %s2573_s27 = int_to_ptr.vmem [resolvable:$false] %s2572_s27 }
  0x20   : > { %1099 = vadd.xlane.f32.xlu1 %v1098_v42  ;;  %v1102_v51 = vadd.f32 %v1101_v39, %v1043_v34  ;;  %v1048_v52 = vunpack.c.h.bf16 %v2858_v37  ;;  %v1049_v53 = vunpack.c.l.bf16 %v2862_v41  ;;  %v2485_v56 = vld [vmem:[%s3435_s1 + $0x18] sm:$0xff]   ;;  %v1052_v58 = vunpack.c.l.bf16 %v2865_v43  ;;  %v2487_v62 = vld [vmem:[%s3435_s1 + $0x10] sm:$0xff]   ;;  %v2894_v0 = vld [vmem:[%s2800_s9 + $0x68] sm:$0xf]  ;;  %307 = vst.msk [vmem:[#allocation2] sm:$0xff] %vm306_vm1, %v2646_v5  ;;  %p2570_p13 = pnand %p2569_p12, %p2722_p4  ;;  %s2574_s29 = scalar_lea.vmem %s2573_s27, 4864 }
  0x21   : > { %v1113_v59 = vadd.f32 %v1051_v45, %v1050_v44  ;;  %v1056_v61 = vunpack.c.l.bf16 %v2872_v50  ;;  %v1106_v63 = vadd.f32 %v1105_v48, %v1046_v47  ;;  %v1057_v1 = vunpack.c.h.bf16 %v2872_v50  ;;  %v2898_v2 = vld [vmem:[%s2800_s9 + $0x78] sm:$0xff]  ;;  %v2903_v6 = vld [vmem:[%s2800_s9 + $0x6c] sm:$0xff]  ;;  %v2907_v12 = vld [vmem:[%s2800_s9 + $0x74] sm:$0xf]  ;;  %308 = vst.msk [vmem:[#allocation2 + $0x8] sm:$0xff] %vm306_vm1, %v2646_v5  ;;  %p2575_p1 = scmp.lt.s32.totalorder %s3384_s15, %s2573_s27  ;;  %p2576_p2 = scmp.lt.s32.totalorder %s2574_s29, %s2568_s24 }
  0x22   : > { %2105 = vmatpush3.bf16.msra.mxu0 %v2483_v11  ;;  %v1109_v60 = vadd.f32 %v1048_v52, %v1047_v49  ;;  %v1053_v3 = vunpack.c.l.bf16 %v2877_v54  ;;  %v1054_v4 = vunpack.c.h.bf16 %v2877_v54  ;;  %v1055_v11 = vunpack.c.l.bf16 %v2880_v55  ;;  %v2488_v14 = vld [vmem:[%s3435_s1 + $0x48] sm:$0xff]   ;;  %v2914_v20 = vld [vmem:[%s2800_s9 + $0x80] sm:$0xf]  ;;  %v2925_v29 = vld [vmem:[%s2800_s9 + $0x90] sm:$0xff]  ;;  %310 = vst.msk [vmem:[#allocation2 + $0x18] sm:$0xff] %vm306_vm1, %v2646_v5  ;;  %p2571_p0 = pneg %p2570_p13 }
  0x23   : > { %2106 = vmatprep.subr.bf16.mxu0 %v2484_v31  ;;  %1095 = vadd.xlane.f32.xlu0 %v1094_v46  ;;  %v1114_v16 = vadd.f32 %v1113_v59, %v1052_v58  ;;  %v1058_v19 = vunpack.c.l.bf16 %v2894_v0  ;;  %v1062_v21 = vunpack.c.l.bf16 %v2898_v2  ;;  %v2489_v22 = vld [vmem:[%s3435_s1 + $0x8] sm:$0xff]   ;;  %v1121_v27 = vadd.f32 %v1057_v1, %v1056_v61  ;;  %v2490_v38 = vld [vmem:[%s3435_s1 + $0x40] sm:$0xff]   ;;  %v2937_v39 = vld [vmem:[%s2800_s9 + $0x98] sm:$0xf]  ;;  %311 = vst.msk [vmem:[#allocation2 + $0x20] sm:$0xff] %vm306_vm1, %v2646_v5  ;;  %p2577_p3 = por %p2576_p2, %p2575_p1 }
  0x24   : > { %1103 = vadd.xlane.f32.xlu1 %v1102_v51  ;;  %v1110_v7 = vadd.f32 %v1109_v60, %v1049_v53  ;;  %v1117_v13 = vadd.f32 %v1054_v4, %v1053_v3  ;;  %v2921_v26 = vld [vmem:[%s2800_s9 + $0x84] sm:$0xff]  ;;  %v1063_v28 = vunpack.c.h.bf16 %v2898_v2  ;;  %v1059_v31 = vunpack.c.l.bf16 %v2903_v6  ;;  %v2930_v33 = vld [vmem:[%s2800_s9 + $0x8c] sm:$0xf]  ;;  %v2942_v45 = vld [vmem:[%s2800_s9 + $0x9c] sm:$0xff]  ;;  %312 = vst.msk [vmem:[#allocation2 + $0x28] sm:$0xff] %vm306_vm1, %v2646_v5 }
  0x25   : > { %v1060_v32 = vunpack.c.h.bf16 %v2903_v6  ;;  %v1061_v36 = vunpack.c.l.bf16 %v2907_v12  ;;  %v1065_v42 = vunpack.c.l.bf16 %v2921_v26  ;;  %v1066_v44 = vunpack.c.h.bf16 %v2921_v26  ;;  %v2491_v49 = vld [vmem:[%s3435_s1] sm:$0xff]   ;;  %v2951_v53 = vld [vmem:[%s2800_s9 + $0xa8] sm:$0xff]  ;;  %v2494_v59 = vld [vmem:[%s3435_s1 + $0xb8] sm:$0xff]   ;;  %313 = vst.msk [vmem:[#allocation2 + $0x30] sm:$0xff] %vm306_vm1, %v2646_v5  ;;  %p2578_p5 = pnand %p2577_p3, %p2571_p0 }
  0x26   : > { %2107 = vmatpush3.bf16.msra.mxu0 %v2485_v56  ;;  %v1118_v34 = vadd.f32 %v1117_v13, %v1055_v11  ;;  %v1064_v46 = vunpack.c.l.bf16 %v2914_v20  ;;  %v1068_v47 = vunpack.c.l.bf16 %v2925_v29  ;;  %v1069_v48 = vunpack.c.h.bf16 %v2925_v29  ;;  %v2955_v58 = vld [vmem:[%s2800_s9 + $0xa4] sm:$0xf]  ;;  %v2966_v1 = vld [vmem:[%s2800_s9 + $0xb0] sm:$0xf]  ;;  %2238 = vmatprep.subr.bf16.mxu1 %v2494_v59  ;;  %314 = vst.msk [vmem:[#allocation2 + $0x38] sm:$0xff] %vm306_vm1, %v2646_v5  ;;  %315 = vst.msk [vmem:[#allocation2 + $0x40] sm:$0xff] %vm306_vm1, %v2646_v5 }
  0x27   : > { %2108 = vmatprep.subr.bf16.mxu0 %v2486_v57  ;;  %1107 = vadd.xlane.f32.xlu0 %v1106_v63  ;;  %v1125_v40 = vadd.f32 %v1060_v32, %v1059_v31  ;;  %v1122_v51 = vadd.f32 %v1121_v27, %v1058_v19  ;;  %v1129_v52 = vadd.f32 %v1063_v28, %v1062_v21  ;;  %v1067_v56 = vunpack.c.l.bf16 %v2930_v33  ;;  %v2495_v63 = vld [vmem:[%s3435_s1 + $0xb0] sm:$0xff]   ;;  %v2979_v19 = vld [vmem:[%s2800_s9 + $0xc0] sm:$0xff]  ;;  %v2986_v28 = vld [vmem:[%s2800_s9 + $0xbc] sm:$0xf] }
  0x28   : > { %1111 = vadd.xlane.f32.xlu1 %v1110_v7  ;;  %v1133_v57 = vadd.f32 %v1066_v44, %v1065_v42  ;;  %v1071_v61 = vunpack.c.l.bf16 %v2942_v45  ;;  %v2003_v3 = vcombine.high %v2806_v8, %v2825_v17  ;;  %v2002_v4 = vcombine.low %v2806_v8, %v2825_v17  ;;  %v2973_v7 = vld [vmem:[%s2800_s9 + $0xb4] sm:$0xff]  ;;  %2239 = vmatpush3.bf16.msra.mxu1 %v2494_v59  ;;  %v2498_v17 = vld [vmem:[%s3435_s1 + $0xa8] sm:$0xff]  }
  0x29   : > { %v1126_v60 = vadd.f32 %v1125_v40, %v1061_v36  ;;  %v1070_v11 = vunpack.c.l.bf16 %v2937_v39  ;;  %v1137_v13 = vadd.f32 %v1069_v48, %v1068_v47  ;;  %v1130_v21 = vadd.f32 %v1129_v52, %v1064_v46  ;;  %2240 = vmatprep.subr.bf16.mxu1 %v2495_v63  ;;  %v2993_v36 = vld [vmem:[%s2800_s9 + $0xcc] sm:$0xff]  ;;  %v2997_v44 = vld [vmem:[%s2800_s9 + $0xc8] sm:$0xf]  ;;  %v3008_v52 = vld [vmem:[%s2800_s9 + $0xd8] sm:$0xff]  ;;  %316 = vst.msk [vmem:[#allocation2 + $0x48] sm:$0xff] %vm306_vm1, %v2646_v5 }
  0x2a   : > { %2109 = vmatpush3.bf16.msra.mxu0 %v2487_v62  ;;  %v1072_v62 = vunpack.c.h.bf16 %v2942_v45  ;;  %v1073_v8 = vunpack.c.l.bf16 %v2955_v58  ;;  %782 = vmatprep.mubr.bf16.mxu0 %v2003_v3  ;;  %v1077_v31 = vunpack.c.l.bf16 %v2973_v7  ;;  %v1078_v32 = vunpack.c.h.bf16 %v2973_v7  ;;  %317 = vst.msk [vmem:[#allocation2 + $0x50] sm:$0xff] %vm306_vm1, %v2646_v5  ;;  %318 = vst.msk [vmem:[#allocation2 + $0x58] sm:$0xff] %vm306_vm1, %v2646_v5 }
  0x2b   : > { %2110 = vmatprep.subr.bf16.mxu0 %v2488_v14  ;;  %1115 = vadd.xlane.f32.xlu0 %v1114_v16  ;;  %v1074_v14 = vunpack.c.l.bf16 %v2951_v53  ;;  %v1075_v16 = vunpack.c.h.bf16 %v2951_v53  ;;  %v1076_v40 = vunpack.c.l.bf16 %v2966_v1  ;;  %v1080_v46 = vunpack.c.l.bf16 %v2979_v19  ;;  %319 = vst.msk [vmem:[#allocation2 + $0x60] sm:$0xff] %vm306_vm1, %v2646_v5  ;;  %320 = vst.msk [vmem:[#allocation2 + $0x68] sm:$0xff] %vm306_vm1, %v2646_v5 }
  0x2c   : > { %1119 = vadd.xlane.f32.xlu1 %v1118_v34  ;;  %v1141_v27 = vadd.f32 %v1072_v62, %v1071_v61  ;;  %v2006_v34 = vcombine.high %v2812_v10, %v2835_v23  ;;  %2241 = vmatpush3.bf16.msra.mxu1 %v2495_v63  ;;  %v1081_v47 = vunpack.c.h.bf16 %v2979_v19  ;;  %v1079_v48 = vunpack.c.l.bf16 %v2986_v28  ;;  %v3013_v61 = vld [vmem:[%s2800_s9 + $0xd4] sm:$0xf]  ;;  %321 = vst.msk [vmem:[#allocation2 + $0x70] sm:$0xff] %vm306_vm1, %v2646_v5 }
  0x2d   : > { %v1145_v42 = vadd.f32 %v1075_v16, %v1074_v14  ;;  %2242 = vmatprep.subr.bf16.mxu1 %v2498_v17  ;;  %v1083_v59 = vunpack.c.l.bf16 %v2993_v36  ;;  %v2005_v62 = vcombine.low %v2812_v10, %v2835_v23  ;;  %v1082_v63 = vunpack.c.l.bf16 %v2997_v44  ;;  %v3026_v10 = vld [vmem:[%s2800_s9 + $0xe0] sm:$0xf]  ;;  %322 = vst.msk [vmem:[#allocation2 + $0x78] sm:$0xff] %vm306_vm1, %v2646_v5  ;;  %323 = vst.msk [vmem:[#allocation2 + $0x80] sm:$0xff] %vm306_vm1, %v2646_v5 }
  0x2e   : > { %2111 = vmatpush3.bf16.msra.mxu0 %v2489_v22  ;;  %v1134_v22 = vadd.f32 %v1133_v57, %v1067_v56  ;;  %v1142_v56 = vadd.f32 %v1141_v27, %v1073_v8  ;;  %v1149_v57 = vadd.f32 %v1078_v32, %v1077_v31  ;;  %v1153_v3 = vadd.f32 %v1081_v47, %v1080_v46 }
  0x2f   : > { %2112 = vmatprep.subr.bf16.mxu0 %v2490_v38  ;;  %1123 = vadd.xlane.f32.xlu0 %v1122_v51  ;;  %v1138_v38 = vadd.f32 %v1137_v13, %v1070_v11  ;;  %v2004_v51 = vcombine.low %v2809_v9, %v2828_v18  ;;  %v2009_v9 = vcombine.high %v2841_v25, %v2858_v37  ;;  %v1087_v11 = vunpack.c.h.bf16 %v3008_v52  ;;  %v2502_v13 = vld [vmem:[%s3435_s1 + $0x98] sm:$0xff]  }
  0x30   : > { %1127 = vadd.xlane.f32.xlu1 %v1126_v60  ;;  %v1084_v60 = vunpack.c.h.bf16 %v2993_v36  ;;  %2243 = vmatpush3.bf16.msra.mxu1 %v2498_v17  ;;  %v1146_v18 = vadd.f32 %v1145_v42, %v1076_v40  ;;  %v1150_v23 = vadd.f32 %v1149_v57, %v1079_v48  ;;  %v1085_v14 = vunpack.c.l.bf16 %v3013_v61  ;;  %v2503_v17 = vld [vmem:[%s3435_s1 + $0x90] sm:$0xff]   ;;  %324 = vst.msk [vmem:[#allocation2 + $0x88] sm:$0xff] %vm306_vm1, %v2646_v5 }
  0x31   : > { %2254 = vmatprep.mubr.bf16.mxu1 %v2004_v51  ;;  %v2008_v31 = vcombine.low %v2841_v25, %v2858_v37  ;;  %v2012_v32 = vcombine.high %v2847_v30, %v2877_v54  ;;  %v2507_v25 = vld [vmem:[%s3435_s1 + $0x80] sm:$0xff]   ;;  %v2647_v37 = vmov 0   ;;  %v2011_v40 = vcombine.low %v2847_v30, %v2877_v54  ;;  %325 = vst.msk [vmem:[#allocation2 + $0x90] sm:$0xff] %vm306_vm1, %v2646_v5 }
  0x32   : > { %2113 = vmatpush3.bf16.msra.mxu0 %v2491_v49  ;;  %v2499_v49 = vld [vmem:[%s3435_s1 + $0xa0] sm:$0xff]   ;;  %v1157_v16 = vadd.f32 %v1084_v60, %v1083_v59  ;;  %2474 = vset.pattern.permute.xlu1 %v2647_v37  ;;  %v2015_v42 = vcombine.high %v2872_v50, %v2903_v6  ;;  %v2007_v46 = vcombine.low %v2821_v15, %v2838_v24 }
  0x33   : > { %1131 = vadd.xlane.f32.xlu0 %v1130_v21  ;;  %2244 = vmatprep.subr.bf16.mxu1 %v2499_v49  ;;  %v1154_v21 = vadd.f32 %v1153_v3, %v1082_v63  ;;  %v2010_v47 = vcombine.low %v2854_v35, %v2862_v41  ;;  %v2014_v48 = vcombine.low %v2872_v50, %v2903_v6  ;;  %v1018_v63 = vld [vmem:[#allocation3 + $0x28] sm:$0xff] }
  0x34   : > { %1135 = vadd.xlane.f32.xlu1 %v1134_v22  ;;  %2339 = vmatprep.subr.mxu0 %v2646_v5  ;;  %v1088_v22 = vunpack.c.l.bf16 %v3026_v10  ;;  %v1158_v27 = vadd.f32 %v1157_v16, %v1085_v14  ;;  %v2018_v30 = vcombine.high %v2898_v2, %v2921_v26  ;;  %v2013_v54 = vcombine.low %v2865_v43, %v2880_v55 }
  0x35   : > { %783 = vmatmul.mubr.bf16.vlgmr.msra.gmra.mxu0 %v2002_v4  ;;  %v1086_v4 = vunpack.c.l.bf16 %v3008_v52  ;;  %2245 = vmatpush3.bf16.msra.mxu1 %v2499_v49  ;;  %v2016_v15 = vcombine.low %v2894_v0, %v2907_v12  ;;  %v2017_v24 = vcombine.low %v2898_v2, %v2921_v26  ;;  %v2021_v35 = vcombine.high %v2925_v29, %v2942_v45 }
  0x36   : > { %790 = vmatprep.mubr.bf16.mxu0 %v2006_v34  ;;  %2246 = vmatprep.subr.bf16.mxu1 %v2502_v13  ;;  %v2019_v41 = vcombine.low %v2914_v20, %v2930_v33  ;;  %v2022_v43 = vcombine.low %v2937_v39, %v2955_v58  ;;  %v2020_v50 = vcombine.low %v2925_v29, %v2942_v45  ;;  %v1423_v39 = vld [vmem:[%s3438_s4 + $0x18] sm:$0xff]  ;;  %v1421_v58 = vld [vmem:[%s3438_s4 + $0x8] sm:$0xff] }
  0x37   : > { %1139 = vadd.xlane.f32.xlu0 %v1138_v38  ;;  %v1161_v8 = vadd.f32 %v1087_v11, %v1086_v4  ;;  %v2506_v38 = vld [vmem:[%s3435_s1 + $0x88] sm:$0xff]   ;;  %v2024_v55 = vcombine.high %v2951_v53, %v2973_v7  ;;  %v2025_v0 = vcombine.low %v2966_v1, %v2986_v28  ;;  %v2028_v2 = vcombine.low %v2997_v44, %v3013_v61  ;;  %v3095_v45 = vld [vmem:[%s3437_s3 + $0x18] sm:$0xff]  ;;  %v3148_v1 = vld [vmem:[%s3437_s3 + $0x10] sm:$0xff] }
  0x38   : > { %1143 = vadd.xlane.f32.xlu1 %v1142_v56  ;;  %2475 = vset.pattern.permute.xlu0 %v2647_v37  ;;  %v2023_v6 = vcombine.low %v2951_v53, %v2973_v7  ;;  %v2027_v12 = vcombine.high %v2979_v19, %v2993_v36  ;;  %v2031_v20 = vcombine.low %v3026_v10, %v3026_v10  ;;  %v1422_v53 = vld [vmem:[%s3438_s4 + $0x10] sm:$0xff]  ;;  %v1420_v7 = vld [vmem:[%s3438_s4] sm:$0xff]  ;;  %v1015_v28 = vld [vmem:[#allocation3 + $0x10] sm:$0xff] }
  0x39   : > { %2247 = vmatpush3.bf16.msra.mxu1 %v2502_v13  ;;  %v1162_v34 = vadd.f32 %v1161_v8, %v1088_v22  ;;  %v2026_v26 = vcombine.low %v2979_v19, %v2993_v36  ;;  %v2030_v29 = vcombine.high %v3008_v52, %v3008_v52  ;;  %v2029_v33 = vcombine.low %v3008_v52, %v3008_v52  ;;  %v1013_v19 = vld [vmem:[#allocation3] sm:$0xff]  ;;  %v1014_v52 = vld [vmem:[#allocation3 + $0x8] sm:$0xff]  ;;  %v1016_v56 = vld [vmem:[#allocation3 + $0x18] sm:$0xff] }
  0x3a   : > { %2248 = vmatprep.subr.bf16.mxu1 %v2503_v17  ;;  %2340 = vmatpush3.msra.mxu0 %v3095_v45  ;;  %v1019_v4 = vld [vmem:[#allocation3 + $0x30] sm:$0xff]  ;;  %v1020_v10 = vld [vmem:[#allocation3 + $0x38] sm:$0xff] }
  0x3b   : > { %1147 = vadd.xlane.f32.xlu0 %v1146_v18  ;;  %2341 = vmatprep.subr.mxu0 %v2646_v5 }
  0x3c   : > { %1151 = vadd.xlane.f32.xlu1 %v1150_v23  ;;  %2342 = vmatpush3.msra.mxu0 %v3148_v1 }
  0x3d   : > { %791 = vmatmul.mubr.bf16.gmra.mxu0 %v2005_v62  ;;  %2249 = vmatpush3.bf16.msra.mxu1 %v2503_v17  ;;  %v1017_v62 = vld [vmem:[#allocation3 + $0x20] sm:$0xff] }
  0x3e   : > { %798 = vmatprep.mubr.bf16.mxu0 %v2009_v9  ;;  %2250 = vmatprep.subr.bf16.mxu1 %v2506_v38  ;;  %v1021_v17 = vld [vmem:[#allocation3 + $0x40] sm:$0xff] }
  0x3f   : > { %1155 = vadd.xlane.f32.xlu0 %v1154_v21  ;;  %2343 = vmatprep.subr.mxu0 %v2646_v5 }
  0x40   : > { %1159 = vadd.xlane.f32.xlu1 %v1158_v27 }
  0x41   : > { %2251 = vmatpush3.bf16.msra.mxu1 %v2506_v38 }
  0x42   : > { %2252 = vmatprep.subr.bf16.mxu1 %v2507_v25 }
  0x43   : > { %1163 = vadd.xlane.f32.xlu0 %v1162_v34  ;;  %v1022_v34 = vld [vmem:[#allocation3 + $0x48] sm:$0xff] }
  0x45   : > { %799 = vmatmul.mubr.bf16.gmra.mxu0 %v2008_v31  ;;  %2253 = vmatpush3.bf16.msra.mxu1 %v2507_v25 }
  0x46   : > { %806 = vmatprep.mubr.bf16.mxu0 %v2012_v32  ;;  %2274 = vmatprep.subr.mxu1 %v2646_v5 }
  0x48   : > { %2255 = vmatmul.mubr.bf16.vlgmr.msra.gmra.mxu1 %v2007_v46  ;;  %v1023_v46 = vld [vmem:[#allocation3 + $0x50] sm:$0xff] }
  0x49   : > { %2258 = vmatprep.mubr.bf16.mxu1 %v2010_v47  ;;  %2275 = vmatpush3.msra.mxu1 %v1423_v39 }
  0x4a   : > { %2276 = vmatprep.subr.mxu1 %v2646_v5 }
  0x4b   : > { %2277 = vmatpush3.msra.mxu1 %v1422_v53  ;;  %v1027_v53 = vld [vmem:[#allocation3 + $0x70] sm:$0xff] }
  0x4c   : > { %2278 = vmatprep.subr.mxu1 %v2646_v5 }
  0x4d   : > { %807 = vmatmul.mubr.bf16.gmra.mxu0 %v2011_v40  ;;  %2279 = vmatpush3.msra.mxu1 %v1421_v58 }
  0x4e   : > { %814 = vmatprep.mubr.bf16.mxu0 %v2015_v42  ;;  %2280 = vmatprep.subr.mxu1 %v2646_v5 }
  0x4f   : > { %2281 = vmatpush3.msra.mxu1 %v1420_v7  ;;  %v1028_v7 = vld [vmem:[#allocation3 + $0x78] sm:$0xff] }
  0x50   : > { %2259 = vmatmul.mubr.bf16.gmra.mxu1 %v2013_v54  ;;  %2404 = vmatprep.subr.mxu1 %v2646_v5 }
  0x51   : > { %2262 = vmatprep.mubr.bf16.mxu1 %v2016_v15 }
  0x55   : > { %815 = vmatmul.mubr.bf16.gmra.mxu0 %v2014_v48 }
  0x56   : > { %822 = vmatprep.mubr.bf16.mxu0 %v2018_v30  ;;  %v1024_v30 = vld [vmem:[#allocation3 + $0x58] sm:$0xff] }
  0x58   : > { %2263 = vmatmul.mubr.bf16.gmra.mxu1 %v2019_v41 }
  0x59   : > { %2266 = vmatprep.mubr.bf16.mxu1 %v2022_v43  ;;  %v3170_v43 = vld [vmem:[%s3437_s3 + $0x8] sm:$0xff] }
  0x5a   : > { %2344 = vmatpush3.msra.mxu0 %v3170_v43 }
  0x5b   : > { %2345 = vmatprep.subr.mxu0 %v2646_v5 }
  0x5d   : > { %823 = vmatmul.mubr.bf16.gmra.mxu0 %v2017_v24 }
  0x5e   : > { %830 = vmatprep.mubr.bf16.mxu0 %v2021_v35 }
  0x60   : > { %2267 = vmatmul.mubr.bf16.gmra.mxu1 %v2025_v0  ;;  %v1026_v0 = vld [vmem:[#allocation3 + $0x68] sm:$0xff] }
  0x61   : > { %2270 = vmatprep.mubr.bf16.mxu1 %v2028_v2 }
  0x65   : > { %831 = vmatmul.mubr.bf16.gmra.mxu0 %v2020_v50  ;;  %v1025_v50 = vld [vmem:[#allocation3 + $0x60] sm:$0xff] }
  0x66   : > { %838 = vmatprep.mubr.bf16.mxu0 %v2024_v55 }
  0x68   : > { %2271 = vmatmul.mubr.bf16.gmra.mxu1 %v2031_v20 }
  0x69   : > { %2282 = vmatprep.mubr.msk.f32.mxu1 %vm2648_vm2, %v2646_v5 }
  0x6d   : > { %839 = vmatmul.mubr.bf16.gmra.mxu0 %v2023_v6  ;;  %v3179_v6 = vld [vmem:[%s3437_s3] sm:$0xff] }
  0x6e   : > { %846 = vmatprep.mubr.bf16.mxu0 %v2027_v12  ;;  %2346 = vmatpush3.msra.mxu0 %v3179_v6 }
  0x75   : > { %847 = vmatmul.mubr.bf16.gmra.mxu0 %v2026_v26  ;;  %v1397_v26 = vld [vmem:[%s3184_s11] sm:$0xff] }
  0x76   : > { %854 = vmatprep.mubr.bf16.mxu0 %v2030_v29 }
  0x7d   : > { %855 = vmatmul.mubr.bf16.gmra.mxu0 %v2029_v33 }
  0x7e   : > { %2347 = vmatprep.mubr.msk.f32.mxu0 %vm2648_vm2, %v2646_v5 }
  0x85   : > { %2348 = vmatmul.mubr.msk.f32.vlgmr.msra.gmra.mxu0 %vm306_vm1, %v1397_v26 }
  0x86   : > { %2350 = vmatprep.mubr.msk.f32.mxu0 %vm2648_vm2, %v2646_v5 }
  0xa8   : > { %v1092_v36 = vpop.xlane.xlu0 %1091 }
  0xa9   : > { %v1165_v44 = vadd.f32 %v1092_v36, %v1013_v19  ;;  %v1100_v49 = vpop.xlane.xlu1 %1099 }
  0xaa   : > { %v1167_v51 = vadd.f32 %v1100_v49, %v1015_v28  ;;  %v1398_v49 = vld [vmem:[%s3184_s11 + $0x8] sm:$0xff] }
  0xab   : > { %1185 = vst.msk [vmem:[#allocation3] sm:$0xff] %vm326_vm0, %v1165_v44  ;;  %2351 = vmatmul.mubr.msk.f32.gmra.mxu0 %vm306_vm1, %v1398_v49  ;;  %v1407_v49 = vld [vmem:[%s3184_s11 + $0x50] sm:$0xff] }
  0xac   : > { %1187 = vst.msk [vmem:[#allocation3 + $0x10] sm:$0xff] %vm326_vm0, %v1167_v51  ;;  %v1096_v57 = vpop.xlane.xlu0 %1095  ;;  %2353 = vmatprep.mubr.msk.f32.mxu0 %vm2648_vm2, %v2646_v5 }
  0xad   : > { %v1166_v59 = vadd.f32 %v1096_v57, %v1014_v52  ;;  %v1104_v60 = vpop.xlane.xlu1 %1103  ;;  %v1029_v57 = vld [vmem:[#allocation3 + $0x80] sm:$0xff] }
  0xae   : > { %v1168_v61 = vadd.f32 %v1104_v60, %v1016_v56 }
  0xaf   : > { %1186 = vst.msk [vmem:[#allocation3 + $0x8] sm:$0xff] %vm326_vm0, %v1166_v59 }
  0xb0   : > { %1188 = vst.msk [vmem:[#allocation3 + $0x18] sm:$0xff] %vm326_vm0, %v1168_v61  ;;  %v1108_v9 = vpop.xlane.xlu0 %1107 }
  0xb1   : > { %v1169_v18 = vadd.f32 %v1108_v9, %v1017_v62  ;;  %v1112_v3 = vpop.xlane.xlu1 %1111  ;;  %v1030_v62 = vld [vmem:[#allocation3 + $0x88] sm:$0xff] }
  0xb2   : > { %v1170_v11 = vadd.f32 %v1112_v3, %v1018_v63  ;;  %v1207_v13 = vld [vmem:[#allocation3] sm:$0xff] }
  0xb3   : > { %1189 = vst.msk [vmem:[#allocation3 + $0x20] sm:$0xff] %vm326_vm0, %v1169_v18  ;;  %v1226_v23 = vadd.f32 1.0, %v1207_v13  ;;  %v1209_v14 = vld [vmem:[#allocation3 + $0x10] sm:$0xff] }
  0xb4   : > { %v1116_v16 = vpop.xlane.xlu0 %1115  ;;  %1190 = vst.msk [vmem:[#allocation3 + $0x28] sm:$0xff] %vm326_vm0, %v1170_v11  ;;  %v1228_v21 = vadd.f32 1.0, %v1209_v14 }
  0xb5   : > { %v1171_v22 = vadd.f32 %v1116_v16, %v1019_v4  ;;  %v1120_v8 = vpop.xlane.xlu1 %1119  ;;  %2530 = vrcp.f32 %v1226_v23  ;;  %v1399_v4 = vld [vmem:[%s3184_s11 + $0x10] sm:$0xff] }
  0xb6   : > { %v1172_v27 = vadd.f32 %v1120_v8, %v1020_v10  ;;  %v1208_v31 = vld [vmem:[#allocation3 + $0x8] sm:$0xff]  ;;  %2532 = vrcp.f32 %v1228_v21  ;;  %v1031_v10 = vld [vmem:[#allocation3 + $0x90] sm:$0xff]  ;;  %2354 = vmatmul.mubr.msk.f32.gmra.mxu0 %vm306_vm1, %v1399_v4 }
  0xb7   : > { %1191 = vst.msk [vmem:[#allocation3 + $0x30] sm:$0xff] %vm326_vm0, %v1171_v22  ;;  %v1227_v32 = vadd.f32 1.0, %v1208_v31  ;;  %v1210_v38 = vld [vmem:[#allocation3 + $0x18] sm:$0xff]  ;;  %2356 = vmatprep.mubr.msk.f32.mxu0 %vm2648_vm2, %v2646_v5 }
  0xb8   : > { %v1124_v25 = vpop.xlane.xlu0 %1123  ;;  %1192 = vst.msk [vmem:[#allocation3 + $0x38] sm:$0xff] %vm326_vm0, %v1172_v27  ;;  %v1229_v37 = vadd.f32 1.0, %v1210_v38  ;;  %v1400_v27 = vld [vmem:[%s3184_s11 + $0x18] sm:$0xff] }
  0xb9   : > { %v1173_v40 = vadd.f32 %v1124_v25, %v1021_v17  ;;  %2534 = vrcp.f32 %v1227_v32  ;;  %v1128_v42 = vpop.xlane.xlu1 %1127 }
  0xba   : > { %v1174_v47 = vadd.f32 %v1128_v42, %v1022_v34  ;;  %v1211_v48 = vld [vmem:[#allocation3 + $0x20] sm:$0xff]  ;;  %2536 = vrcp.f32 %v1229_v37  ;;  %2357 = vmatmul.mubr.msk.f32.gmra.mxu0 %vm306_vm1, %v1400_v27 }
  0xbb   : > { %1193 = vst.msk [vmem:[#allocation3 + $0x40] sm:$0xff] %vm326_vm0, %v1173_v40  ;;  %v1230_v54 = vadd.f32 1.0, %v1211_v48  ;;  %v1212_v24 = vld [vmem:[#allocation3 + $0x28] sm:$0xff]  ;;  %2359 = vmatprep.mubr.msk.f32.mxu0 %vm2648_vm2, %v2646_v5 }
  0xbc   : > { %v1132_v15 = vpop.xlane.xlu0 %1131  ;;  %1194 = vst.msk [vmem:[#allocation3 + $0x48] sm:$0xff] %vm326_vm0, %v1174_v47  ;;  %v1231_v2 = vadd.f32 1.0, %v1212_v24  ;;  %v1401_v40 = vld [vmem:[%s3184_s11 + $0x20] sm:$0xff] }
  0xbd   : > { %v1175_v35 = vadd.f32 %v1132_v15, %v1023_v46  ;;  %v1136_v41 = vpop.xlane.xlu1 %1135  ;;  %2538 = vrcp.f32 %v1230_v54  ;;  %v1402_v54 = vld [vmem:[%s3184_s11 + $0x28] sm:$0xff] }
  0xbe   : > { %v1176_v55 = vadd.f32 %v1136_v41, %v1024_v30  ;;  %v1213_v20 = vld [vmem:[#allocation3 + $0x30] sm:$0xff]  ;;  %2540 = vrcp.f32 %v1231_v2  ;;  %2360 = vmatmul.mubr.msk.f32.gmra.mxu0 %vm306_vm1, %v1401_v40 }
  0xbf   : > { %1195 = vst.msk [vmem:[#allocation3 + $0x50] sm:$0xff] %vm326_vm0, %v1175_v35  ;;  %v1232_v19 = vadd.f32 1.0, %v1213_v20  ;;  %v1214_v44 = vld [vmem:[#allocation3 + $0x38] sm:$0xff]  ;;  %2362 = vmatprep.mubr.msk.f32.mxu0 %vm2648_vm2, %v2646_v5 }
  0xc0   : > { %v1140_v12 = vpop.xlane.xlu0 %1139  ;;  %1196 = vst.msk [vmem:[#allocation3 + $0x58] sm:$0xff] %vm326_vm0, %v1176_v55  ;;  %v1233_v63 = vadd.f32 1.0, %v1214_v44 }
  0xc1   : > { %v1177_v29 = vadd.f32 %v1140_v12, %v1025_v50  ;;  %v1144_v33 = vpop.xlane.xlu1 %1143  ;;  %2542 = vrcp.f32 %v1232_v19 }
  0xc2   : > { %v2531_v39 = vpop.eup %2530  ;;  %v1178_v58 = vadd.f32 %v1144_v33, %v1026_v0  ;;  %v1215_v3 = vld [vmem:[#allocation3 + $0x40] sm:$0xff]  ;;  %2363 = vmatmul.mubr.msk.f32.gmra.mxu0 %vm306_vm1, %v1402_v54  ;;  %v1403_v0 = vld [vmem:[%s3184_s11 + $0x30] sm:$0xff] }
  0xc3   : > { %1197 = vst.msk [vmem:[#allocation3 + $0x60] sm:$0xff] %vm326_vm0, %v1177_v29  ;;  %1285 = vperm.xlu1 %2474, %v2531_v39   ;;  %v2533_v28 = vpop.eup %2532  ;;  %v1234_v21 = vadd.f32 1.0, %v1215_v3  ;;  %v1216_v17 = vld [vmem:[#allocation3 + $0x48] sm:$0xff]  ;;  %2365 = vmatprep.mubr.msk.f32.mxu0 %vm2648_vm2, %v2646_v5  ;;  %v1404_v29 = vld [vmem:[%s3184_s11 + $0x38] sm:$0xff] }
  0xc4   : > { %v1148_v36 = vpop.xlane.xlu0 %1147  ;;  %1198 = vst.msk [vmem:[#allocation3 + $0x68] sm:$0xff] %vm326_vm0, %v1178_v58  ;;  %v1235_v38 = vadd.f32 1.0, %v1216_v17  ;;  %v1405_v58 = vld [vmem:[%s3184_s11 + $0x40] sm:$0xff]  ;;  %v386_v17 = vld [vmem:[#allocation2 + $0x10] sm:$0xff] }
  0xc5   : > { %v1179_v51 = vadd.f32 %v1148_v36, %v1027_v53  ;;  %v1152_v52 = vpop.xlane.xlu1 %1151 }
  0xc6   : > { %v2535_v56 = vpop.eup %2534  ;;  %v1180_v59 = vadd.f32 %v1152_v52, %v1028_v7  ;;  %v1217_v60 = vld [vmem:[#allocation3 + $0x50] sm:$0xff]  ;;  %2366 = vmatmul.mubr.msk.f32.gmra.mxu0 %vm306_vm1, %v1403_v0  ;;  %v1408_v52 = vld [vmem:[%s3184_s11 + $0x58] sm:$0xff] }
  0xc7   : > { %1199 = vst.msk [vmem:[#allocation3 + $0x70] sm:$0xff] %vm326_vm0, %v1179_v51  ;;  %1295 = vperm.xlu1 %2474, %v2533_v28   ;;  %1290 = vperm.xlu0 %2475, %v2535_v56   ;;  %v1236_v61 = vadd.f32 1.0, %v1217_v60  ;;  %v2537_v9 = vpop.eup %2536  ;;  %v1218_v37 = vld [vmem:[#allocation3 + $0x58] sm:$0xff]  ;;  %v1406_v28 = vld [vmem:[%s3184_s11 + $0x48] sm:$0xff] }
  0xc8   : > { %v1156_v18 = vpop.xlane.xlu0 %1155  ;;  %1200 = vst.msk [vmem:[#allocation3 + $0x78] sm:$0xff] %vm326_vm0, %v1180_v59  ;;  %v1237_v47 = vadd.f32 1.0, %v1218_v37  ;;  %2368 = vmatprep.mubr.msk.f32.mxu0 %vm2648_vm2, %v2646_v5 }
  0xc9   : > { %v1181_v11 = vadd.f32 %v1156_v18, %v1029_v57  ;;  %2544 = vrcp.f32 %v1236_v61  ;;  %v1160_v13 = vpop.xlane.xlu1 %1159  ;;  %v1409_v57 = vld [vmem:[%s3184_s11 + $0x60] sm:$0xff]  ;;  %v1410_v61 = vld [vmem:[%s3184_s11 + $0x68] sm:$0xff] }
  0xca   : > { %v1182_v23 = vadd.f32 %v1160_v13, %v1030_v62  ;;  %v1219_v14 = vld [vmem:[#allocation3 + $0x60] sm:$0xff]  ;;  %2546 = vrcp.f32 %v1233_v63  ;;  %v2539_v22 = vpop.eup %2538  ;;  %2369 = vmatmul.mubr.msk.f32.gmra.mxu0 %vm306_vm1, %v1404_v29 }
  0xcb   : > { %1201 = vst.msk [vmem:[#allocation3 + $0x80] sm:$0xff] %vm326_vm0, %v1181_v11  ;;  %1300 = vperm.xlu1 %2474, %v2537_v9   ;;  %v1238_v16 = vadd.f32 1.0, %v1219_v14  ;;  %v2541_v25 = vpop.eup %2540  ;;  %v1220_v30 = vld [vmem:[#allocation3 + $0x68] sm:$0xff]  ;;  %2371 = vmatprep.mubr.msk.f32.mxu0 %vm2648_vm2, %v2646_v5 }
  0xcc   : > { %v1164_v8 = vpop.xlane.xlu0 %1163  ;;  %1202 = vst.msk [vmem:[#allocation3 + $0x88] sm:$0xff] %vm326_vm0, %v1182_v23  ;;  %v1239_v41 = vadd.f32 1.0, %v1220_v30 }
  0xcd   : > { %v1183_v31 = vadd.f32 %v1164_v8, %v1031_v10  ;;  %2548 = vrcp.f32 %v1238_v16 }
  0xce   : > { %v1221_v32 = vld [vmem:[#allocation3 + $0x70] sm:$0xff]  ;;  %2550 = vrcp.f32 %v1234_v21  ;;  %v2543_v48 = vpop.eup %2542  ;;  %2372 = vmatmul.mubr.msk.f32.gmra.mxu0 %vm306_vm1, %v1405_v58 }
  0xcf   : > { %1203 = vst.msk [vmem:[#allocation3 + $0x90] sm:$0xff] %vm326_vm0, %v1183_v31  ;;  %1305 = vperm.xlu1 %2474, %v2539_v22   ;;  %v1240_v34 = vadd.f32 1.0, %v1221_v32  ;;  %v1222_v55 = vld [vmem:[#allocation3 + $0x78] sm:$0xff]  ;;  %2374 = vmatprep.mubr.msk.f32.mxu0 %vm2648_vm2, %v2646_v5 }
  0xd0   : > { %v1241_v12 = vadd.f32 1.0, %v1222_v55 }
  0xd1   : > { %2552 = vrcp.f32 %v1240_v34 }
  0xd2   : > { %v1223_v42 = vld [vmem:[#allocation3 + $0x80] sm:$0xff]  ;;  %2554 = vrcp.f32 %v1235_v38  ;;  %2375 = vmatmul.mubr.msk.f32.gmra.mxu0 %vm306_vm1, %v1406_v28  ;;  %v384_v38 = vld [vmem:[#allocation2] sm:$0xff] }
  0xd3   : > { %1310 = vperm.xlu1 %2474, %v2541_v25   ;;  %v1242_v46 = vadd.f32 1.0, %v1223_v42  ;;  %v1224_v26 = vld [vmem:[#allocation3 + $0x88] sm:$0xff]  ;;  %2377 = vmatprep.mubr.msk.f32.mxu0 %vm2648_vm2, %v2646_v5 }
  0xd4   : > { %v1243_v39 = vadd.f32 1.0, %v1224_v26 }
  0xd5   : > { %2556 = vrcp.f32 %v1242_v46 }
  0xd6   : > { %v2545_v15 = vpop.eup %2544  ;;  %v1225_v24 = vld [vmem:[#allocation3 + $0x90] sm:$0xff]  ;;  %2558 = vrcp.f32 %v1237_v47  ;;  %2378 = vmatmul.mubr.msk.f32.gmra.mxu0 %vm306_vm1, %v1407_v49  ;;  %v387_v47 = vld [vmem:[#allocation2 + $0x18] sm:$0xff] }
  0xd7   : > { %1315 = vperm.xlu1 %2474, %v2543_v48   ;;  %1335 = vperm.xlu0 %2475, %v2545_v15   ;;  %v1244_v35 = vadd.f32 1.0, %v1225_v24  ;;  %v2547_v50 = vpop.eup %2546 }
  0xd8   : > { %2380 = vmatprep.mubr.msk.f32.mxu0 %vm2648_vm2, %v2646_v5 }
  0xd9   : > { %2560 = vrcp.f32 %v1244_v35  ;;  %v385_v35 = vld [vmem:[#allocation2 + $0x8] sm:$0xff] }
  0xda   : > { %v2549_v2 = vpop.eup %2548  ;;  %2562 = vrcp.f32 %v1239_v41  ;;  %2381 = vmatmul.mubr.msk.f32.gmra.mxu0 %vm306_vm1, %v1408_v52 }
  0xdb   : > { %1320 = vperm.xlu1 %2474, %v2547_v50   ;;  %1345 = vperm.xlu0 %2475, %v2549_v2   ;;  %v2551_v20 = vpop.eup %2550  ;;  %2564 = vrcp.f32 %v1241_v12  ;;  %v390_v12 = vld [vmem:[#allocation2 + $0x30] sm:$0xff] }
  0xdc   : > { %2566 = vrcp.f32 %v1243_v39  ;;  %2383 = vmatprep.mubr.msk.f32.mxu0 %vm2648_vm2, %v2646_v5 }
  0xde   : > { %v2553_v33 = vpop.eup %2552  ;;  %2384 = vmatmul.mubr.msk.f32.gmra.mxu0 %vm306_vm1, %v1409_v57  ;;  %v389_v57 = vld [vmem:[#allocation2 + $0x28] sm:$0xff] }
  0xdf   : > { %1325 = vperm.xlu1 %2474, %v2551_v20   ;;  %1355 = vperm.xlu0 %2475, %v2553_v33   ;;  %v2555_v53 = vpop.eup %2554 }
  0xe0   : > { %2386 = vmatprep.mubr.msk.f32.mxu0 %vm2648_vm2, %v2646_v5 }
  0xe2   : > { %v2557_v7 = vpop.eup %2556  ;;  %2387 = vmatmul.mubr.msk.f32.gmra.mxu0 %vm306_vm1, %v1410_v61 }
  0xe3   : > { %1330 = vperm.xlu1 %2474, %v2555_v53   ;;  %1365 = vperm.xlu0 %2475, %v2557_v7   ;;  %v2559_v19 = vpop.eup %2558  ;;  %v388_v53 = vld [vmem:[#allocation2 + $0x20] sm:$0xff] }
  0xe6   : > { %v2561_v36 = vpop.eup %2560 }
  0xe7   : > { %1340 = vperm.xlu1 %2474, %v2559_v19   ;;  %1375 = vperm.xlu0 %2475, %v2561_v36   ;;  %v2563_v44 = vpop.eup %2562 }
  0xe8   : > { %v2565_v51 = vpop.eup %2564 }
  0xe9   : > { %v2567_v56 = vpop.eup %2566 }
  0xeb   : > { %1350 = vperm.xlu1 %2474, %v2563_v44   ;;  %v391_v44 = vld [vmem:[#allocation2 + $0x38] sm:$0xff] }
  0xef   : > { %1360 = vperm.xlu1 %2474, %v2565_v51  }
  0xf3   : > { %1370 = vperm.xlu1 %2474, %v2567_v56  }
  0xf5   : > { %v2114_v59 = vpop.f32.mrf.mxu0 }
  0xf7   : > { %v2115_v60 = vpop.f32.mrf.mxu0 }
  0xf8   : > { %v2116_v22 = vadd.f32 %v2115_v60, %v2114_v59 }
  0xf9   : > { %v2117_v62 = vpop.f32.mrf.mxu0 }
  0xfb   : > { %v2118_v63 = vpop.f32.mrf.mxu0 }
  0xfc   : > { %v2119_v37 = vadd.f32 %v2118_v63, %v2117_v62 }
  0xfd   : > { %v2120_v9 = vpop.f32.mrf.mxu0 }
  0xff   : > { %v2121_v18 = vpop.f32.mrf.mxu0 }
 0x100   : > { %v2122_v16 = vadd.f32 %v2121_v18, %v2120_v9  ;;  %v394_v18 = vld [vmem:[#allocation2 + $0x50] sm:$0xff] }
 0x101   : > { %v2123_v3 = vpop.f32.mrf.mxu0 }
 0x103   : > { %v2124_v4 = vpop.f32.mrf.mxu0 }
 0x104   : > { %v2125_v31 = vadd.f32 %v2124_v4, %v2123_v3 }
 0x105   : > { %v2126_v11 = vpop.f32.mrf.mxu0 }
 0x107   : > { %v2127_v13 = vpop.f32.mrf.mxu0 }
 0x108   : > { %v2256_v27 = vpop.f32.mrf.mxu1  ;;  %v2128_v50 = vadd.f32 %v2127_v13, %v2126_v11 }
 0x109   : > { %v2129_v10 = vpop.f32.mrf.mxu0  ;;  %v905_v32 = vadd.f32 %v2256_v27, %v2122_v16 }
 0x10a   : > { %v896_v25 = vpop.f32.mrf.mxu1 }
 0x10b   : > { %v2130_v23 = vpop.f32.mrf.mxu0  ;;  %v976_v40 = vadd.f32 %v905_v32, %v386_v17  ;;  %v897_v42 = vadd.f32 %v2116_v22, %v896_v25  ;;  %v395_v17 = vld [vmem:[#allocation2 + $0x58] sm:$0xff] }
 0x10c   : > { %v2257_v48 = vpop.f32.mrf.mxu1  ;;  %v2131_v7 = vadd.f32 %v2130_v23, %v2129_v10  ;;  %v392_v10 = vld [vmem:[#allocation2 + $0x40] sm:$0xff] }
 0x10d   : > { %v2132_v14 = vpop.f32.mrf.mxu0  ;;  %996 = vst.msk [vmem:[#allocation2 + $0x10] sm:$0xff] %vm306_vm1, %v976_v40  ;;  %v974_v54 = vadd.f32 %v897_v42, %v384_v38  ;;  %v908_v15 = vadd.f32 %v2257_v48, %v2125_v31  ;;  %v393_v38 = vld [vmem:[#allocation2 + $0x48] sm:$0xff] }
 0x10e   : > { %v899_v41 = vpop.f32.mrf.mxu1 }
 0x10f   : > { %v2133_v21 = vpop.f32.mrf.mxu0  ;;  %994 = vst.msk [vmem:[#allocation2] sm:$0xff] %vm306_vm1, %v974_v54  ;;  %v977_v55 = vadd.f32 %v908_v15, %v387_v47  ;;  %v900_v0 = vadd.f32 %v2119_v37, %v899_v41  ;;  %v396_v54 = vld [vmem:[#allocation2 + $0x60] sm:$0xff] }
 0x110   : > { %v2134_v30 = vadd.f32 %v2133_v21, %v2132_v14  ;;  %v2260_v20 = vpop.f32.mrf.mxu1 }
 0x111   : > { %v2135_v8 = vpop.f32.mrf.mxu0  ;;  %997 = vst.msk [vmem:[#allocation2 + $0x18] sm:$0xff] %vm306_vm1, %v977_v55  ;;  %v975_v29 = vadd.f32 %v900_v0, %v385_v35 }
 0x112   : > { %v921_v33 = vadd.f32 %v2260_v20, %v2134_v30  ;;  %v912_v58 = vpop.f32.mrf.mxu1 }
 0x113   : > { %v2136_v34 = vpop.f32.mrf.mxu0  ;;  %995 = vst.msk [vmem:[#allocation2 + $0x8] sm:$0xff] %vm306_vm1, %v975_v29  ;;  %v913_v28 = vadd.f32 %v2128_v50, %v912_v58 }
 0x114   : > { %v2137_v26 = vadd.f32 %v2136_v34, %v2135_v8  ;;  %v980_v19 = vadd.f32 %v921_v33, %v390_v12  ;;  %v2261_v49 = vpop.f32.mrf.mxu1  ;;  %v398_v33 = vld [vmem:[#allocation2 + $0x70] sm:$0xff] }
 0x115   : > { %v2138_v46 = vpop.f32.mrf.mxu0  ;;  %v978_v51 = vadd.f32 %v913_v28, %v388_v53 }
 0x116   : > { %1000 = vst.msk [vmem:[#allocation2 + $0x30] sm:$0xff] %vm306_vm1, %v980_v19  ;;  %v924_v52 = vadd.f32 %v2261_v49, %v2137_v26  ;;  %v915_v59 = vpop.f32.mrf.mxu1  ;;  %v399_v49 = vld [vmem:[#allocation2 + $0x78] sm:$0xff] }
 0x117   : > { %v2139_v24 = vpop.f32.mrf.mxu0  ;;  %998 = vst.msk [vmem:[#allocation2 + $0x20] sm:$0xff] %vm306_vm1, %v978_v51  ;;  %v916_v63 = vadd.f32 %v2131_v7, %v915_v59 }
 0x118   : > { %v2140_v60 = vadd.f32 %v2139_v24, %v2138_v46  ;;  %v981_v62 = vadd.f32 %v924_v52, %v391_v44  ;;  %v2264_v3 = vpop.f32.mrf.mxu1 }
 0x119   : > { %v2141_v2 = vpop.f32.mrf.mxu0  ;;  %v979_v4 = vadd.f32 %v916_v63, %v389_v57 }
 0x11a   : > { %1001 = vst.msk [vmem:[#allocation2 + $0x38] sm:$0xff] %vm306_vm1, %v981_v62  ;;  %v928_v23 = vpop.f32.mrf.mxu1 }
 0x11b   : > { %v2142_v39 = vpop.f32.mrf.mxu0  ;;  %999 = vst.msk [vmem:[#allocation2 + $0x28] sm:$0xff] %vm306_vm1, %v979_v4  ;;  %v929_v22 = vadd.f32 %v2140_v60, %v928_v23 }
 0x11c   : > { %v2143_v14 = vadd.f32 %v2142_v39, %v2141_v2  ;;  %v2265_v27 = vpop.f32.mrf.mxu1  ;;  %v397_v2 = vld [vmem:[#allocation2 + $0x68] sm:$0xff] }
 0x11d   : > { %v2144_v36 = vpop.f32.mrf.mxu0  ;;  %v982_v31 = vadd.f32 %v929_v22, %v392_v10 }
 0x11e   : > { %v931_v25 = vpop.f32.mrf.mxu1 }
 0x11f   : > { %v2145_v56 = vpop.f32.mrf.mxu0  ;;  %1002 = vst.msk [vmem:[#allocation2 + $0x40] sm:$0xff] %vm306_vm1, %v982_v31  ;;  %v932_v42 = vadd.f32 %v2143_v14, %v931_v25  ;;  %v1265_v25 = vld [vmem:[#allocation2 + $0x8] sm:$0xff] }
 0x120   : > { %v2146_v61 = vadd.f32 %v2145_v56, %v2144_v36  ;;  %v2268_v47 = vpop.f32.mrf.mxu1 }
 0x121   : > { %v2147_v9 = vpop.f32.mrf.mxu0  ;;  %v983_v48 = vadd.f32 %v932_v42, %v393_v38 }
 0x122   : > { %v937_v11 = vadd.f32 %v2264_v3, %v2146_v61  ;;  %v944_v15 = vpop.f32.mrf.mxu1  ;;  %v400_v61 = vld [vmem:[#allocation2 + $0x80] sm:$0xff] }
 0x123   : > { %v2148_v13 = vpop.f32.mrf.mxu0  ;;  %1003 = vst.msk [vmem:[#allocation2 + $0x48] sm:$0xff] %vm306_vm1, %v983_v48  ;;  %v1268_v48 = vld [vmem:[#allocation2 + $0x20] sm:$0xff] }
 0x124   : > { %v2149_v16 = vadd.f32 %v2148_v13, %v2147_v9  ;;  %v984_v21 = vadd.f32 %v937_v11, %v394_v18  ;;  %v2269_v50 = vpop.f32.mrf.mxu1  ;;  %v401_v11 = vld [vmem:[#allocation2 + $0x88] sm:$0xff] }
 0x125   : > { %v2150_v8 = vpop.f32.mrf.mxu0 }
 0x126   : > { %1004 = vst.msk [vmem:[#allocation2 + $0x50] sm:$0xff] %vm306_vm1, %v984_v21  ;;  %v940_v32 = vadd.f32 %v2265_v27, %v2149_v16  ;;  %v947_v12 = vpop.f32.mrf.mxu1  ;;  %v402_v16 = vld [vmem:[#allocation2 + $0x90] sm:$0xff] }
 0x127   : > { %v2151_v34 = vpop.f32.mrf.mxu0 }
 0x128   : > { %v2152_v37 = vadd.f32 %v2151_v34, %v2150_v8  ;;  %v985_v40 = vadd.f32 %v940_v32, %v395_v17  ;;  %v2272_v39 = vpop.f32.mrf.mxu1  ;;  %v1264_v8 = vld [vmem:[#allocation2] sm:$0xff] }
 0x129   : > { %v2153_v46 = vpop.f32.mrf.mxu0 }
 0x12a   : > { %1005 = vst.msk [vmem:[#allocation2 + $0x58] sm:$0xff] %vm306_vm1, %v985_v40  ;;  %v945_v35 = vadd.f32 %v2152_v37, %v944_v15  ;;  %v960_v19 = vpop.f32.mrf.mxu1  ;;  %v1266_v40 = vld [vmem:[#allocation2 + $0x10] sm:$0xff] }
 0x12b   : > { %v2154_v30 = vpop.f32.mrf.mxu0 }
 0x12c   : > { %v2155_v24 = vadd.f32 %v2154_v30, %v2153_v46  ;;  %v986_v55 = vadd.f32 %v945_v35, %v396_v54  ;;  %v2273_v51 = vpop.f32.mrf.mxu1  ;;  %v1267_v46 = vld [vmem:[#allocation2 + $0x18] sm:$0xff]  ;;  %v1269_v54 = vld [vmem:[#allocation2 + $0x28] sm:$0xff] }
 0x12d   : > { %v2156_v41 = vpop.f32.mrf.mxu0 }
 0x12e   : > { %1006 = vst.msk [vmem:[#allocation2 + $0x60] sm:$0xff] %vm306_vm1, %v986_v55  ;;  %v948_v26 = vadd.f32 %v2155_v24, %v947_v12  ;;  %v963_v9 = vpop.f32.mrf.mxu1  ;;  %v1270_v24 = vld [vmem:[#allocation2 + $0x30] sm:$0xff] }
 0x12f   : > { %v2157_v0 = vpop.f32.mrf.mxu0 }
 0x130   : > { %v2158_v20 = vadd.f32 %v2157_v0, %v2156_v41  ;;  %v987_v58 = vadd.f32 %v948_v26, %v397_v2  ;;  %v1272_v2 = vld [vmem:[#allocation2 + $0x40] sm:$0xff]  ;;  %v1273_v26 = vld [vmem:[#allocation2 + $0x48] sm:$0xff] }
 0x131   : > { %v2159_v29 = vpop.f32.mrf.mxu0 }
 0x132   : > { %v953_v53 = vadd.f32 %v2268_v47, %v2158_v20  ;;  %1007 = vst.msk [vmem:[#allocation2 + $0x68] sm:$0xff] %vm306_vm1, %v987_v58 }
 0x133   : > { %v2160_v7 = vpop.f32.mrf.mxu0 }
 0x134   : > { %v2161_v28 = vadd.f32 %v2160_v7, %v2159_v29  ;;  %v988_v36 = vadd.f32 %v953_v53, %v398_v33  ;;  %v1275_v7 = vld [vmem:[#allocation2 + $0x58] sm:$0xff] }
 0x135   : > { %v2162_v44 = vpop.f32.mrf.mxu0 }
 0x136   : > { %1008 = vst.msk [vmem:[#allocation2 + $0x70] sm:$0xff] %vm306_vm1, %v988_v36  ;;  %v956_v52 = vadd.f32 %v2269_v50, %v2161_v28  ;;  %v1271_v50 = vld [vmem:[#allocation2 + $0x38] sm:$0xff]  ;;  %v1276_v36 = vld [vmem:[#allocation2 + $0x60] sm:$0xff] }
 0x137   : > { %v2163_v56 = vpop.f32.mrf.mxu0 }
 0x138   : > { %v2164_v57 = vadd.f32 %v2163_v56, %v2162_v44  ;;  %v989_v59 = vadd.f32 %v956_v52, %v399_v49 }
 0x139   : > { %v2165_v60 = vpop.f32.mrf.mxu0  ;;  %v1277_v51 = vld [vmem:[#allocation2 + $0x68] sm:$0xff] }
 0x13a   : > { %1009 = vst.msk [vmem:[#allocation2 + $0x78] sm:$0xff] %vm306_vm1, %v989_v59  ;;  %v961_v62 = vadd.f32 %v2164_v57, %v960_v19 }
 0x13b   : > { %v2166_v63 = vpop.f32.mrf.mxu0 }
 0x13c   : > { %v2167_v18 = vadd.f32 %v2166_v63, %v2165_v60  ;;  %v990_v3 = vadd.f32 %v961_v62, %v400_v61 }
 0x13d   : > { %v2168_v4 = vpop.f32.mrf.mxu0  ;;  %v1278_v57 = vld [vmem:[#allocation2 + $0x70] sm:$0xff] }
 0x13e   : > { %1010 = vst.msk [vmem:[#allocation2 + $0x80] sm:$0xff] %vm306_vm1, %v990_v3  ;;  %v964_v13 = vadd.f32 %v2167_v18, %v963_v9  ;;  %v1286_v22 = vpop.permute.xlu1 %1285 }
 0x13f   : > { %v2169_v10 = vpop.f32.mrf.mxu0  ;;  %v1378_v27 = vmul.f32 %v1286_v22, %v1264_v8  ;;  %v1411_v8 = vld [vmem:[%s3184_s11 + $0x70] sm:$0xff] }
 0x140   : > { %v2170_v23 = vadd.f32 %v2169_v10, %v2168_v4  ;;  %v991_v14 = vadd.f32 %v964_v13, %v401_v11 }
 0x141   : > { %v2171_v21 = vpop.f32.mrf.mxu0  ;;  %2283 = vmatmul.mubr.msk.f32.vlgmr.msra.gmra.mxu1 %vm306_vm1, %v1378_v27  ;;  %v1279_v61 = vld [vmem:[#allocation2 + $0x78] sm:$0xff] }
 0x142   : > { %v969_v17 = vadd.f32 %v2272_v39, %v2170_v23  ;;  %1011 = vst.msk [vmem:[#allocation2 + $0x88] sm:$0xff] %vm306_vm1, %v991_v14  ;;  %2408 = vmatpush3.msra.mxu1 %v3095_v45  ;;  %v1296_v34 = vpop.permute.xlu1 %1295  ;;  %v1291_v38 = vpop.permute.xlu0 %1290  ;;  %2285 = vmatprep.mubr.msk.f32.mxu1 %vm2648_vm2, %v2646_v5  ;;  %v1274_v39 = vld [vmem:[#allocation2 + $0x50] sm:$0xff] }
 0x143   : > { %v2172_v31 = vpop.f32.mrf.mxu0  ;;  %v1379_v37 = vmul.f32 %v1291_v38, %v1265_v25  ;;  %2405 = vmatprep.subr.mxu1 %v2646_v5  ;;  %v1380_v45 = vmul.f32 %v1296_v34, %v1266_v40  ;;  %v1413_v38 = vld [vmem:[%s3184_s11 + $0x80] sm:$0xff]  ;;  %v1414_v40 = vld [vmem:[%s3184_s11 + $0x88] sm:$0xff] }
 0x144   : > { %v992_v32 = vadd.f32 %v969_v17, %v402_v16  ;;  %2409 = vmatpush3.msra.mxu1 %v3148_v1  ;;  %v1412_v31 = vld [vmem:[%s3184_s11 + $0x78] sm:$0xff] }
 0x145   : > { %2286 = vmatmul.mubr.msk.f32.gmra.mxu1 %vm306_vm1, %v1379_v37  ;;  %2406 = vmatprep.subr.mxu1 %v2646_v5  ;;  %v1280_v9 = vld [vmem:[#allocation2 + $0x80] sm:$0xff]  ;;  %v1764_v11 = vpop.f32.mrf.mxu0 }
 0x146   : > { %1012 = vst.msk [vmem:[#allocation2 + $0x90] sm:$0xff] %vm306_vm1, %v992_v32  ;;  %v1301_v42 = vpop.permute.xlu1 %1300  ;;  %2288 = vmatprep.mubr.msk.f32.mxu1 %vm2648_vm2, %v2646_v5  ;;  %2410 = vmatpush3.msra.mxu1 %v3170_v43 }
 0x147   : > { %2407 = vmatprep.subr.mxu1 %v2646_v5  ;;  %v1381_v47 = vmul.f32 %v1301_v42, %v1267_v46  ;;  %v2349_v14 = vpop.f32.mrf.mxu0  ;;  %v1415_v46 = vld [vmem:[%s3184_s11 + $0x90] sm:$0xff] }
 0x148   : > { %2411 = vmatpush3.msra.mxu1 %v3179_v6 }
 0x149   : > { %2289 = vmatmul.mubr.msk.f32.gmra.mxu1 %vm306_vm1, %v1380_v45  ;;  %v1281_v4 = vld [vmem:[#allocation2 + $0x88] sm:$0xff] }
 0x14a   : > { %v1306_v1 = vpop.permute.xlu1 %1305  ;;  %2291 = vmatprep.mubr.msk.f32.mxu1 %vm2648_vm2, %v2646_v5 }
 0x14b   : > { %v1382_v43 = vmul.f32 %v1306_v1, %v1268_v48 }
 0x14d   : > { %2292 = vmatmul.mubr.msk.f32.gmra.mxu1 %vm306_vm1, %v1381_v47  ;;  %v1282_v23 = vld [vmem:[#allocation2 + $0x90] sm:$0xff] }
 0x14e   : > { %v1311_v30 = vpop.permute.xlu1 %1310  ;;  %2294 = vmatprep.mubr.msk.f32.mxu1 %vm2648_vm2, %v2646_v5 }
 0x14f   : > { %v1383_v15 = vmul.f32 %v1311_v30, %v1269_v54 }
 0x151   : > { %2295 = vmatmul.mubr.msk.f32.gmra.mxu1 %vm306_vm1, %v1382_v43 }
 0x152   : > { %v1316_v6 = vpop.permute.xlu1 %1315  ;;  %2297 = vmatprep.mubr.msk.f32.mxu1 %vm2648_vm2, %v2646_v5  ;;  %v1336_v33 = vpop.permute.xlu0 %1335 }
 0x153   : > { %v1384_v41 = vmul.f32 %v1316_v6, %v1270_v24  ;;  %v1388_v53 = vmul.f32 %v1336_v33, %v1274_v39 }
 0x155   : > { %2298 = vmatmul.mubr.msk.f32.gmra.mxu1 %vm306_vm1, %v1383_v15 }
 0x156   : > { %v1321_v35 = vpop.permute.xlu1 %1320  ;;  %2300 = vmatprep.mubr.msk.f32.mxu1 %vm2648_vm2, %v2646_v5  ;;  %v1346_v28 = vpop.permute.xlu0 %1345 }
 0x157   : > { %v1385_v0 = vmul.f32 %v1321_v35, %v1271_v50  ;;  %v1390_v44 = vmul.f32 %v1346_v28, %v1276_v36 }
 0x159   : > { %2301 = vmatmul.mubr.msk.f32.gmra.mxu1 %vm306_vm1, %v1384_v41 }
 0x15a   : > { %v1326_v55 = vpop.permute.xlu1 %1325  ;;  %2303 = vmatprep.mubr.msk.f32.mxu1 %vm2648_vm2, %v2646_v5  ;;  %v1356_v56 = vpop.permute.xlu0 %1355 }
 0x15b   : > { %v1386_v12 = vmul.f32 %v1326_v55, %v1272_v2  ;;  %v1392_v59 = vmul.f32 %v1356_v56, %v1278_v57 }
 0x15d   : > { %2304 = vmatmul.mubr.msk.f32.gmra.mxu1 %vm306_vm1, %v1385_v0 }
 0x15e   : > { %2306 = vmatprep.mubr.msk.f32.mxu1 %vm2648_vm2, %v2646_v5  ;;  %v1331_v20 = vpop.permute.xlu1 %1330  ;;  %v1366_v63 = vpop.permute.xlu0 %1365 }
 0x15f   : > { %v1387_v29 = vmul.f32 %v1331_v20, %v1273_v26  ;;  %v1394_v18 = vmul.f32 %v1366_v63, %v1280_v9 }
 0x161   : > { %2307 = vmatmul.mubr.msk.f32.gmra.mxu1 %vm306_vm1, %v1386_v12 }
 0x162   : > { %2309 = vmatprep.mubr.msk.f32.mxu1 %vm2648_vm2, %v2646_v5  ;;  %v1341_v58 = vpop.permute.xlu1 %1340  ;;  %v1376_v10 = vpop.permute.xlu0 %1375 }
 0x163   : > { %v1389_v19 = vmul.f32 %v1341_v58, %v1275_v7  ;;  %v1396_v21 = vmul.f32 %v1376_v10, %v1282_v23 }
 0x165   : > { %2310 = vmatmul.mubr.msk.f32.gmra.mxu1 %vm306_vm1, %v1387_v29 }
 0x166   : > { %2312 = vmatprep.mubr.msk.f32.mxu1 %vm2648_vm2, %v2646_v5  ;;  %v1351_v49 = vpop.permute.xlu1 %1350 }
 0x167   : > { %v1391_v52 = vmul.f32 %v1351_v49, %v1277_v51 }
 0x169   : > { %2313 = vmatmul.mubr.msk.f32.gmra.mxu1 %vm306_vm1, %v1388_v53 }
 0x16a   : > { %2315 = vmatprep.mubr.msk.f32.mxu1 %vm2648_vm2, %v2646_v5  ;;  %v1361_v60 = vpop.permute.xlu1 %1360 }
 0x16b   : > { %v1393_v62 = vmul.f32 %v1361_v60, %v1279_v61  ;;  %v1769_v16 = vpop.f32.mrf.mxu0 }
 0x16d   : > { %2316 = vmatmul.mubr.msk.f32.gmra.mxu1 %vm306_vm1, %v1389_v19  ;;  %v2352_v22 = vpop.f32.mrf.mxu0 }
 0x16e   : > { %2318 = vmatprep.mubr.msk.f32.mxu1 %vm2648_vm2, %v2646_v5  ;;  %v1371_v3 = vpop.permute.xlu1 %1370 }
 0x16f   : > { %v1395_v13 = vmul.f32 %v1371_v3, %v1281_v4 }
 0x171   : > { %2319 = vmatmul.mubr.msk.f32.gmra.mxu1 %vm306_vm1, %v1390_v44 }
 0x172   : > { %2321 = vmatprep.mubr.msk.f32.mxu1 %vm2648_vm2, %v2646_v5 }
 0x175   : > { %2322 = vmatmul.mubr.msk.f32.gmra.mxu1 %vm306_vm1, %v1391_v52 }
 0x176   : > { %2324 = vmatprep.mubr.msk.f32.mxu1 %vm2648_vm2, %v2646_v5  ;;  %v1774_v17 = vpop.f32.mrf.mxu0 }
 0x178   : > { %v2355_v27 = vpop.f32.mrf.mxu0 }
 0x179   : > { %2325 = vmatmul.mubr.msk.f32.gmra.mxu1 %vm306_vm1, %v1392_v59 }
 0x17a   : > { %2327 = vmatprep.mubr.msk.f32.mxu1 %vm2648_vm2, %v2646_v5  ;;  %v1779_v32 = vpop.f32.mrf.mxu0 }
 0x17c   : > { %v2358_v34 = vpop.f32.mrf.mxu0 }
 0x17d   : > { %2328 = vmatmul.mubr.msk.f32.gmra.mxu1 %vm306_vm1, %v1393_v62 }
 0x17e   : > { %2330 = vmatprep.mubr.msk.f32.mxu1 %vm2648_vm2, %v2646_v5  ;;  %v1784_v25 = vpop.f32.mrf.mxu0 }
 0x180   : > { %v2361_v37 = vpop.f32.mrf.mxu0 }
 0x181   : > { %2331 = vmatmul.mubr.msk.f32.gmra.mxu1 %vm306_vm1, %v1394_v18 }
 0x182   : > { %2333 = vmatprep.mubr.msk.f32.mxu1 %vm2648_vm2, %v2646_v5  ;;  %v1789_v42 = vpop.f32.mrf.mxu0 }
 0x184   : > { %v2364_v45 = vpop.f32.mrf.mxu0 }
 0x185   : > { %2334 = vmatmul.mubr.msk.f32.gmra.mxu1 %vm306_vm1, %v1395_v13 }
 0x186   : > { %2336 = vmatprep.mubr.msk.f32.mxu1 %vm2648_vm2, %v2646_v5  ;;  %v1794_v1 = vpop.f32.mrf.mxu0 }
 0x188   : > { %v2367_v47 = vpop.f32.mrf.mxu0 }
 0x189   : > { %2337 = vmatmul.mubr.msk.f32.gmra.mxu1 %vm306_vm1, %v1396_v21 }
 0x18a   : > { %2389 = vmatprep.mubr.msk.f32.mxu1 %vm2648_vm2, %v2646_v5  ;;  %v1799_v48 = vpop.f32.mrf.mxu0 }
 0x18c   : > { %v2370_v30 = vpop.f32.mrf.mxu0 }
 0x18d   : > { %2390 = vmatmul.mubr.msk.f32.vlgmr.msra.gmra.mxu1 %vm306_vm1, %v1411_v8 }
 0x18e   : > { %2392 = vmatprep.mubr.msk.f32.mxu1 %vm2648_vm2, %v2646_v5  ;;  %v1804_v43 = vpop.f32.mrf.mxu0 }
 0x190   : > { %v2373_v54 = vpop.f32.mrf.mxu0 }
 0x191   : > { %2393 = vmatmul.mubr.msk.f32.gmra.mxu1 %vm306_vm1, %v1412_v31 }
 0x192   : > { %2395 = vmatprep.mubr.msk.f32.mxu1 %vm2648_vm2, %v2646_v5  ;;  %v1809_v6 = vpop.f32.mrf.mxu0 }
 0x194   : > { %v2376_v15 = vpop.f32.mrf.mxu0 }
 0x195   : > { %2396 = vmatmul.mubr.msk.f32.gmra.mxu1 %vm306_vm1, %v1413_v38 }
 0x196   : > { %2398 = vmatprep.mubr.msk.f32.mxu1 %vm2648_vm2, %v2646_v5  ;;  %v1814_v24 = vpop.f32.mrf.mxu0 }
 0x198   : > { %v2379_v35 = vpop.f32.mrf.mxu0 }
 0x199   : > { %2399 = vmatmul.mubr.msk.f32.gmra.mxu1 %vm306_vm1, %v1414_v40 }
 0x19a   : > { %2401 = vmatprep.mubr.msk.f32.mxu1 %vm2648_vm2, %v2646_v5  ;;  %v1819_v41 = vpop.f32.mrf.mxu0 }
 0x19c   : > { %v2382_v50 = vpop.f32.mrf.mxu0 }
 0x19d   : > { %2402 = vmatmul.mubr.msk.f32.gmra.mxu1 %vm306_vm1, %v1415_v46 }
 0x19e   : > { %v1824_v55 = vpop.f32.mrf.mxu0 }
 0x1a0   : > { %v2385_v0 = vpop.f32.mrf.mxu0 }
 0x1a2   : > { %v1829_v5 = vpop.f32.mrf.mxu0 }
 0x1a4   : > { %v2388_v2 = vpop.f32.mrf.mxu0 }
 0x201   : > { %v1547_v12 = vpop.f32.mrf.mxu1 }
 0x202   : > { %v1765_v20 = vadd.f32 %v1764_v11, %v1547_v12 }
 0x203   : > { %v2284_v26 = vpop.f32.mrf.mxu1 }
 0x204   : > { %1858 = vst [vmem:[%s3357_s13] sm:$0xff] %v1765_v20 }
 0x205   : > { %v1552_v29 = vpop.f32.mrf.mxu1 }
 0x206   : > { %v1770_v33 = vadd.f32 %v1769_v16, %v1552_v29 }
 0x207   : > { %v2287_v39 = vpop.f32.mrf.mxu1 }
 0x208   : > { %1859 = vst [vmem:[%s3357_s13 + $0x8] sm:$0xff] %v1770_v33 }
 0x209   : > { %v1557_v53 = vpop.f32.mrf.mxu1 }
 0x20a   : > { %v1775_v58 = vadd.f32 %v1774_v17, %v1557_v53 }
 0x20b   : > { %v2290_v7 = vpop.f32.mrf.mxu1 }
 0x20c   : > { %1860 = vst [vmem:[%s3357_s13 + $0x10] sm:$0xff] %v1775_v58 }
 0x20d   : > { %v1562_v19 = vpop.f32.mrf.mxu1 }
 0x20e   : > { %v1780_v28 = vadd.f32 %v1779_v32, %v1562_v19 }
 0x20f   : > { %v2293_v36 = vpop.f32.mrf.mxu1 }
 0x210   : > { %1861 = vst [vmem:[%s3357_s13 + $0x18] sm:$0xff] %v1780_v28 }
 0x211   : > { %v1567_v44 = vpop.f32.mrf.mxu1 }
 0x212   : > { %v1785_v49 = vadd.f32 %v1784_v25, %v1567_v44 }
 0x213   : > { %v2296_v51 = vpop.f32.mrf.mxu1 }
 0x214   : > { %1862 = vst [vmem:[%s3357_s13 + $0x20] sm:$0xff] %v1785_v49 }
 0x215   : > { %v1572_v52 = vpop.f32.mrf.mxu1 }
 0x216   : > { %v1790_v56 = vadd.f32 %v1789_v42, %v1572_v52 }
 0x217   : > { %v2299_v57 = vpop.f32.mrf.mxu1 }
 0x218   : > { %1863 = vst [vmem:[%s3357_s13 + $0x28] sm:$0xff] %v1790_v56 }
 0x219   : > { %v1577_v59 = vpop.f32.mrf.mxu1 }
 0x21a   : > { %v1795_v60 = vadd.f32 %v1794_v1, %v1577_v59 }
 0x21b   : > { %v2302_v61 = vpop.f32.mrf.mxu1 }
 0x21c   : > { %1864 = vst [vmem:[%s3357_s13 + $0x30] sm:$0xff] %v1795_v60 }
 0x21d   : > { %v1582_v62 = vpop.f32.mrf.mxu1 }
 0x21e   : > { %v1800_v63 = vadd.f32 %v1799_v48, %v1582_v62 }
 0x21f   : > { %v2305_v9 = vpop.f32.mrf.mxu1 }
 0x220   : > { %1865 = vst [vmem:[%s3357_s13 + $0x38] sm:$0xff] %v1800_v63 }
 0x221   : > { %v1587_v18 = vpop.f32.mrf.mxu1 }
 0x222   : > { %v1805_v3 = vadd.f32 %v1804_v43, %v1587_v18 }
 0x223   : > { %v2308_v4 = vpop.f32.mrf.mxu1 }
 0x224   : > { %1866 = vst [vmem:[%s3357_s13 + $0x40] sm:$0xff] %v1805_v3 }
 0x225   : > { %v1592_v11 = vpop.f32.mrf.mxu1 }
 0x226   : > { %v1810_v13 = vadd.f32 %v1809_v6, %v1592_v11 }
 0x227   : > { %v2311_v10 = vpop.f32.mrf.mxu1 }
 0x228   : > { %1867 = vst [vmem:[%s3357_s13 + $0x48] sm:$0xff] %v1810_v13 }
 0x229   : > { %v1597_v23 = vpop.f32.mrf.mxu1 }
 0x22a   : > { %v1815_v14 = vadd.f32 %v1814_v24, %v1597_v23 }
 0x22b   : > { %v2314_v16 = vpop.f32.mrf.mxu1 }
 0x22c   : > { %1868 = vst [vmem:[%s3357_s13 + $0x50] sm:$0xff] %v1815_v14 }
 0x22d   : > { %v1602_v21 = vpop.f32.mrf.mxu1 }
 0x22e   : > { %v1820_v22 = vadd.f32 %v1819_v41, %v1602_v21 }
 0x22f   : > { %v2317_v8 = vpop.f32.mrf.mxu1 }
 0x230   : > { %1869 = vst [vmem:[%s3357_s13 + $0x58] sm:$0xff] %v1820_v22 }
 0x231   : > { %v1607_v17 = vpop.f32.mrf.mxu1 }
 0x232   : > { %v1825_v27 = vadd.f32 %v1824_v55, %v1607_v17 }
 0x233   : > { %v2320_v31 = vpop.f32.mrf.mxu1 }
 0x234   : > { %1870 = vst [vmem:[%s3357_s13 + $0x60] sm:$0xff] %v1825_v27 }
 0x235   : > { %v1612_v32 = vpop.f32.mrf.mxu1 }
 0x236   : > { %v1830_v34 = vadd.f32 %v1829_v5, %v1612_v32 }
 0x237   : > { %v2323_v38 = vpop.f32.mrf.mxu1 }
 0x238   : > { %1871 = vst [vmem:[%s3357_s13 + $0x68] sm:$0xff] %v1830_v34 }
 0x239   : > { %v1617_v25 = vpop.f32.mrf.mxu1 }
 0x23b   : > { %v2326_v37 = vpop.f32.mrf.mxu1 }
 0x23d   : > { %v1622_v40 = vpop.f32.mrf.mxu1 }
 0x23f   : > { %v2329_v42 = vpop.f32.mrf.mxu1 }
 0x241   : > { %v1627_v45 = vpop.f32.mrf.mxu1 }
 0x243   : > { %v2332_v46 = vpop.f32.mrf.mxu1 }
 0x245   : > { %v1632_v1 = vpop.f32.mrf.mxu1 }
 0x247   : > { %v2335_v47 = vpop.f32.mrf.mxu1 }
 0x249   : > { %v1637_v48 = vpop.f32.mrf.mxu1 }
 0x24b   : > { %v2338_v30 = vpop.f32.mrf.mxu1 }
 0x24d   : > { %v1834_v43 = vpop.f32.mrf.mxu1 }
 0x24e   : > { %v1835_v54 = vadd.f32 %v1834_v43, %v1617_v25 }
 0x24f   : > { %v2391_v6 = vpop.f32.mrf.mxu1 }
 0x250   : > { %1872 = vst [vmem:[%s3357_s13 + $0x70] sm:$0xff] %v1835_v54 }
 0x251   : > { %v1839_v15 = vpop.f32.mrf.mxu1 }
 0x252   : > { %v1840_v24 = vadd.f32 %v1839_v15, %v1622_v40 }
 0x253   : > { %v2394_v35 = vpop.f32.mrf.mxu1 }
 0x254   : > { %1873 = vst [vmem:[%s3357_s13 + $0x78] sm:$0xff] %v1840_v24 }
 0x255   : > { %v1844_v41 = vpop.f32.mrf.mxu1 }
 0x256   : > { %v1845_v50 = vadd.f32 %v1844_v41, %v1627_v45 }
 0x257   : > { %v2397_v55 = vpop.f32.mrf.mxu1 }
 0x258   : > { %1874 = vst [vmem:[%s3357_s13 + $0x80] sm:$0xff] %v1845_v50 }
 0x259   : > { %v1849_v0 = vpop.f32.mrf.mxu1 }
 0x25a   : > { %v1850_v5 = vadd.f32 %v1849_v0, %v1632_v1 }
 0x25b   : > { %v2400_v2 = vpop.f32.mrf.mxu1 }
 0x25c   : > { %1875 = vst [vmem:[%s3357_s13 + $0x88] sm:$0xff] %v1850_v5 }
 0x25d   : > { %v1854_v12 = vpop.f32.mrf.mxu1 }
 0x25e   : > { %v1855_v20 = vadd.f32 %v1854_v12, %v1637_v48 }
 0x25f   : > { %v2403_v26 = vpop.f32.mrf.mxu1 }
 0x260   : > { %1876 = vst [vmem:[%s3357_s13 + $0x90] sm:$0xff] %v1855_v20 }
 0x261   : > { %2581 = shalt.err (!%p2578_p5)
}
 0x262   : > { %s2582_s8 = scalar_lea.hbm %s3382_s17, 2432  ;;  %s2586_s7 = scalar_lea.hbm %s3439_s5, 4864 }
 0x263   : > { %p2583_p6 = scmp.ne.s32.totalorder %s3382_s17, %s2582_s8  ;;  %p2587_p10 = scmp.lt.s32.totalorder %s3382_s17, %s3439_s5 }
 0x264   : > { %p2588_p11 = scmp.lt.s32.totalorder %s2586_s7, %s2582_s8 }
 0x265   : > { %p2584_p7 = pnand %p2583_p6, %p2722_p4 }
 0x266   : > { %p2589_p12 = por %p2588_p11, %p2587_p10 }
 0x267   : > { %p2585_p9 = pneg %p2584_p7 }
 0x269   : > { %p2590_p13 = pnand %p2589_p12, %p2585_p9 }
 0x26b   : > { %2593 = shalt.err (!%p2590_p13)
}
 0x26c   : > { %s2650_s14 = smov 128   ;;  %s2651_s9 = smov 8  }
 0x26d   : > { %2414 = dma.vmem_to_hbm [thread:$0]  (%p2722_p4), %s3384_s15, 2432, %s3382_s17, %s3389_s21, %s2650_s14, %s2650_s14, %s2651_s9  }
 0x26e PF: > { %p2420_p0 = scmp.ge.s32.totalorder %s2644_s23, 2  ;;  %s1906_s16 = sand.u32 1, %s2624_s18  }
 0x26f   : > { %s1907_s24 = scalar_lea.sflag [#allocation5], %s1906_s16 }
 0x270   : > { %p2417_p1 = pnand %p2420_p0, %p2729_p8 }
 0x272   : > { %p2418_p2 = pneg %p2417_p1 }
 0x274   : > { %2619 = dma.done.wait (%p2418_p2), %s1907_s24, 2432  }
 0x275   : > { %2621 = vsyncadd (%p2418_p2), %s1907_s24, 4294964864  ;;  %s18_s23 = sadd.s32 1, %s2644_s23   ;;  %s3442_s18 = smov %s2628_s19 }
 0x276   : > { %p15_p3 = scmp.ge.s32.totalorder %s18_s23, 4   ;;  %s3443_s19 = smov %s2632_s20 }
 0x277   : > { %s3444_s20 = smov %s2735_s6  ;;  %s3445_s21 = smov %s2640_s22 }
 0x278   : > { %s3446_s22 = smov %s3448_s26  ;;  %17 = sbr.rel (!%p15_p3) target bundleno = 4 (0x4), region = 89 }
 0x27d   :  { %1912 = vsyncpa [#allocation5], 1 }
 0x27e   :  { %1914 = vsyncpa [#allocation5 + $0x1], 1 }

</bundles_post_ra>
